<compile_context>
chip_gen: v6e
topology: v6e:2x2x1
jax: 0.10.0
libtpu: 0.0.40
codegen_flags: <defaults>
</compile_context>

<pallas_src>
import functools
import math

import jax
import jax.numpy as jnp
from jax import lax
from jax.experimental import pallas as pl
from jax.experimental.pallas import tpu as pltpu


def _relu6(v):
    return jnp.clip(v, 0.0, 6.0)


def _sigmoid(v):
    # 1/(1+exp(-v)); the divide goes to the EUP approx-reciprocal slot.
    return pl.reciprocal(1.0 + jnp.exp(-v), approx=True)


def _bottleneck_lstm_kernel(
    x_ref, h_ref, c_ref,
    wdw_ref, wdwb_ref,                 # depthwise W taps (9, Cin, 1), bias (Cin, 1)
    wyx_ref, wyh_ref, wyb_ref,         # Wy split: (Ch, Cin) bf16, (Ch, Ch) bf16, (Ch, 1) f32
    widw_ref,                          # depthwise Wi taps (9, Ch, 1)
    wg_ref,                            # fused [Wi_t|Wf_t|Wo_t|Wconv]: (4*Ch, Ch) bf16
    ht_ref, ct_ref,                    # outputs (1, Ch, H*W) f32
    *, H, W,
):
    HW = H * W
    Ch = h_ref.shape[1]

    # ---- boundary masks, built once and shared by both depthwise convs ----
    pos = lax.broadcasted_iota(jnp.int32, (1, HW), 1)      # flat pixel index
    col = pos % W                                           # column within row
    hmask = {-1: (col > 0).astype(jnp.float32),             # dx = -1 valid
             0: None,
             1: (col < W - 1).astype(jnp.float32)}          # dx = +1 valid
    vmask = {-1: (pos >= W).astype(jnp.float32),            # dy = -1 valid
             0: None,
             1: (pos < (H - 1) * W).astype(jnp.float32)}    # dy = +1 valid

    def _tap_mask(dy, dx):
        m = vmask[dy]
        if hmask[dx] is not None:
            m = hmask[dx] if m is None else m * hmask[dx]
        return m

    masks = [_tap_mask(k // 3 - 1, k % 3 - 1) for k in range(9)]

    def dw3x3(xcm, taps_ref, bias):
        """Depthwise 3x3 conv, padding=1, on a channel-major (C, HW) slab.

        Pixel (h+dy, w+dx) sits at flat lane r + dy*W + dx, so each tap is a
        lane roll of the slab; the masks above kill both the horizontal and
        the vertical wrap-around introduced by the rotation.  taps_ref[k] is
        the per-channel weight column for tap k = ky*3 + kx (cross-correlation
        order, like nn.Conv2d).
        """
        acc = xcm * taps_ref[4]                    # center tap: no shift/mask
        if bias is not None:
            acc = acc + bias                       # bias folded into init
        for k in range(9):
            if k == 4:
                continue
            dy, dx = k // 3 - 1, k % 3 - 1
            off = dy * W + dx
            # pltpu.roll == jnp.roll: result[:, r] = xcm[:, (r + off) % HW]
            t = pltpu.roll(xcm, (-off) % HW, 1) * masks[k]
            acc = acc + t * taps_ref[k]
        return acc

    # ---- x = W(x): depthwise 3x3 + bias, channel-major (Cin, HW) ----------
    xw = dw3x3(x_ref[0], wdw_ref, wdwb_ref[...])

    # ---- i = Wy(cat(x, h)): split 1x1 conv == two bf16 MXU matmuls --------
    i_pre = (
        jnp.dot(wyx_ref[...], xw.astype(jnp.bfloat16),
                preferred_element_type=jnp.float32)
        + jnp.dot(wyh_ref[...], h_ref[0].astype(jnp.bfloat16),
                  preferred_element_type=jnp.float32)
        + wyb_ref[...]
    )

    # ---- b = relu6(Wi(i)): depthwise 3x3, no bias --------------------------
    b = _relu6(dw3x3(i_pre, widw_ref, None))

    # ---- all four gate 1x1 convs as ONE bf16 MXU matmul: (4Ch,Ch)@(Ch,HW) --
    gates = jnp.dot(wg_ref[...], b.astype(jnp.bfloat16),
                    preferred_element_type=jnp.float32)      # (4*Ch, HW) f32
    sig = _sigmoid(gates[:3 * Ch, :])         # one full-lane sigmoid pass
    i_t = sig[0 * Ch:1 * Ch, :]
    f_t = sig[1 * Ch:2 * Ch, :]
    o_t = sig[2 * Ch:3 * Ch, :]
    g = _relu6(gates[3 * Ch:4 * Ch, :])

    # ---- elementwise recurrence (f32, lane-dense) ---------------------------
    c_t = f_t * c_ref[0] + i_t * g
    h_t = o_t * _relu6(c_t)
    ct_ref[0] = c_t
    ht_ref[0] = h_t


def prepare_params(params, cin, ch):
    """Torch-layout conv weights -> channel-major kernel layouts.  Call once
    per model and reuse across timesteps (do NOT redo this per step)."""
    wdw = params["W_w"][:, 0].reshape(cin, 9).T[..., None]         # (9, Cin, 1)
    widw = params["Wi_w"][:, 0].reshape(ch, 9).T[..., None]        # (9, Ch, 1)
    wy = params["Wy_w"][:, :, 0, 0]                                # (Ch, Cin+Ch)
    wg = jnp.concatenate(
        [params["Wi_t_w"][:, :, 0, 0], params["Wf_t_w"][:, :, 0, 0],
         params["Wo_t_w"][:, :, 0, 0], params["Wconv_w"][:, :, 0, 0]],
        axis=0).astype(jnp.bfloat16)                               # (4*Ch, Ch)
    return {
        "wdw": wdw.astype(jnp.float32),
        "wdwb": params["W_b"].reshape(cin, 1).astype(jnp.float32),
        "wyx": wy[:, :cin].astype(jnp.bfloat16),                   # (Ch, Cin)
        "wyh": wy[:, cin:].astype(jnp.bfloat16),                   # (Ch, Ch)
        "wyb": params["Wy_b"].reshape(ch, 1).astype(jnp.float32),
        "widw": widw.astype(jnp.float32),
        "wg": wg,
    }


def bottleneck_lstm_cell_packed(xp, hp, cp, pw, H, W):
    """Packed (channel-major) cell: xp (B, Cin, H*W); hp, cp (B, Ch, H*W) —
    i.e. NCHW with the spatial dims flattened.  Returns (h_t, c_t) in the same
    packed layout so a timestep loop never reshapes the recurrent state."""
    B, Cin, HW = xp.shape
    Ch = hp.shape[1]

    def full(a):
        zeros = (0,) * a.ndim
        return pl.BlockSpec(a.shape, lambda b: zeros)

    def per_batch(C):
        return pl.BlockSpec((1, C, HW), lambda b: (b, 0, 0))

    h_t, c_t = pl.pallas_call(
        functools.partial(_bottleneck_lstm_kernel, H=H, W=W),
        grid=(B,),
        in_specs=[
            per_batch(Cin), per_batch(Ch), per_batch(Ch),
            full(pw["wdw"]), full(pw["wdwb"]),
            full(pw["wyx"]), full(pw["wyh"]), full(pw["wyb"]),
            full(pw["widw"]), full(pw["wg"]),
        ],
        out_specs=(per_batch(Ch), per_batch(Ch)),
        out_shape=(
            jax.ShapeDtypeStruct((B, Ch, HW), jnp.float32),
            jax.ShapeDtypeStruct((B, Ch, HW), jnp.float32),
        ),
        compiler_params=pltpu.CompilerParams(
            dimension_semantics=("parallel",)),
    )(xp, hp, cp, pw["wdw"], pw["wdwb"], pw["wyx"], pw["wyh"], pw["wyb"],
      pw["widw"], pw["wg"])
    return h_t, c_t


@jax.jit
def bottleneck_lstm_cell(x, h, c, params):
    """Public wrapper matching the PyTorch module: NCHW in, NCHW out.  The
    channel-major packed layout is just NCHW flattened over (H, W), so the
    glue is pure reshapes.  For a multi-timestep loop, call prepare_params()
    once and drive bottleneck_lstm_cell_packed directly."""
    B, Cin, H, W = x.shape
    Ch = h.shape[1]
    pw = prepare_params(params, Cin, Ch)
    xp = x.reshape(B, Cin, H * W)
    hp = h.reshape(B, Ch, H * W)
    cp = c.reshape(B, Ch, H * W)
    h_t, c_t = bottleneck_lstm_cell_packed(xp, hp, cp, pw, H, W)
    return h_t.reshape(B, Ch, H, W), c_t.reshape(B, Ch, H, W)


# ------------------------- reference (pure JAX) ----------------------------
def ref_bottleneck_lstm_cell(x, h, c, p):
    relu6 = lambda v: jnp.clip(v, 0.0, 6.0)
    dn = ("NCHW", "OIHW", "NCHW")

    def dw3x3(v, w, bias=None):
        out = lax.conv_general_dilated(
            v, w, (1, 1), ((1, 1), (1, 1)), dimension_numbers=dn,
            feature_group_count=v.shape[1], precision=lax.Precision.HIGHEST)
        return out if bias is None else out + bias[None, :, None, None]

    def pw(v, w, bias=None):
        out = lax.conv_general_dilated(
            v, w, (1, 1), "VALID", dimension_numbers=dn,
            precision=lax.Precision.HIGHEST)
        return out if bias is None else out + bias[None, :, None, None]

    xc = dw3x3(x, p["W_w"], p["W_b"])
    y = jnp.concatenate([xc, h], axis=1)
    i = pw(y, p["Wy_w"], p["Wy_b"])
    b = relu6(dw3x3(i, p["Wi_w"]))
    i_t = jax.nn.sigmoid(pw(b, p["Wi_t_w"]))
    f_t = jax.nn.sigmoid(pw(b, p["Wf_t_w"]))
    o_t = jax.nn.sigmoid(pw(b, p["Wo_t_w"]))
    c_t = f_t * c + i_t * relu6(pw(b, p["Wconv_w"]))
    h_t = o_t * relu6(c_t)
    return h_t, c_t


# ------------------------- deterministic params ----------------------------
def init_params(key, cin, ch):
    def xavier(k, shape):  # torch nn.init.xavier_uniform_ for conv (O,I,kH,kW)
        o, i, kh, kw = shape
        a = math.sqrt(6.0 / (i * kh * kw + o * kh * kw))
        return jax.random.uniform(k, shape, jnp.float32, -a, a)

    ks = jax.random.split(key, 8)
    return {
        "W_w": xavier(ks[0], (cin, 1, 3, 3)),
        "W_b": jnp.zeros((cin,), jnp.float32),      # biases zeroed in __init__
        "Wy_w": xavier(ks[1], (ch, cin + ch, 1, 1)),
        "Wy_b": jnp.zeros((ch,), jnp.float32),
        "Wi_w": xavier(ks[2], (ch, 1, 3, 3)),
        "Wi_t_w": xavier(ks[3], (ch, ch, 1, 1)),
        "Wf_t_w": xavier(ks[4], (ch, ch, 1, 1)),
        "Wo_t_w": xavier(ks[5], (ch, ch, 1, 1)),
        "Wc_t_w": xavier(ks[6], (ch, ch, 1, 1)),    # defined but unused in forward
        "Wconv_w": xavier(ks[7], (ch, ch, 1, 1)),
    }


if __name__ == "__main__":
    key = jax.random.PRNGKey(0)
    B, Cin, Ch, H, W = 2, 8, 32, 16, 16          # hidden_channels % 2 == 0
    k1, k2, k3, kp = jax.random.split(key, 4)
    x = jax.random.normal(k1, (B, Cin, H, W), jnp.float32)
    h = jax.random.normal(k2, (B, Ch, H, W), jnp.float32)
    c = jax.random.normal(k3, (B, Ch, H, W), jnp.float32)
    params = init_params(kp, Cin, Ch)

    h_t, c_t = jax.block_until_ready(bottleneck_lstm_cell(x, h, c, params))

    h_ref, c_ref = ref_bottleneck_lstm_cell(x, h, c, params)
    assert h_t.shape == (B, Ch, H, W) and c_t.shape == (B, Ch, H, W)
    # bf16 MXU matmuls + approx-reciprocal sigmoid -> ~1e-2 worst-case,
    # ~1e-3 mean deviation from the f32 reference at this scale.
    assert bool(jnp.allclose(h_t, h_ref, atol=2e-2, rtol=2e-2))
    assert bool(jnp.allclose(c_t, c_ref, atol=2e-2, rtol=2e-2))
    print("KERNEL_OK")
</pallas_src>

<mosaic_0001>
module attributes {stable_mosaic.version = 11 : i64} {
  func.func @_bottleneck_lstm_kernel(%arg0: i32, %arg1: memref<1x8x256xf32, #tpu.memory_space<vmem>>, %arg2: memref<1x32x256xf32, #tpu.memory_space<vmem>>, %arg3: memref<1x32x256xf32, #tpu.memory_space<vmem>>, %arg4: memref<9x8x1xf32, #tpu.memory_space<vmem>>, %arg5: memref<8x1xf32, #tpu.memory_space<vmem>>, %arg6: memref<32x8xbf16, #tpu.memory_space<vmem>>, %arg7: memref<32x32xbf16, #tpu.memory_space<vmem>>, %arg8: memref<32x1xf32, #tpu.memory_space<vmem>>, %arg9: memref<9x32x1xf32, #tpu.memory_space<vmem>>, %arg10: memref<128x32xbf16, #tpu.memory_space<vmem>>, %arg11: memref<1x32x256xf32, #tpu.memory_space<vmem>>, %arg12: memref<1x32x256xf32, #tpu.memory_space<vmem>>) attributes {dimension_semantics = [#tpu.dimension_semantics<parallel>], iteration_bounds = array<i64: 2>, scalar_prefetch = 0 : i64, scratch_operands = 0 : i64, tpu.core_type = #tpu.core_type<tc>, window_params = [{transform_indices = @transform_0, window_bounds = array<i64: 1, 8, 256>}, {transform_indices = @transform_1, window_bounds = array<i64: 1, 32, 256>}, {transform_indices = @transform_2, window_bounds = array<i64: 1, 32, 256>}, {pipeline_mode = #tpu.pipeline_mode<synchronous>, transform_indices = @transform_3, window_bounds = array<i64: 9, 8, 1>}, {pipeline_mode = #tpu.pipeline_mode<synchronous>, transform_indices = @transform_4, window_bounds = array<i64: 8, 1>}, {pipeline_mode = #tpu.pipeline_mode<synchronous>, transform_indices = @transform_5, window_bounds = array<i64: 32, 8>}, {pipeline_mode = #tpu.pipeline_mode<synchronous>, transform_indices = @transform_6, window_bounds = array<i64: 32, 32>}, {pipeline_mode = #tpu.pipeline_mode<synchronous>, transform_indices = @transform_7, window_bounds = array<i64: 32, 1>}, {pipeline_mode = #tpu.pipeline_mode<synchronous>, transform_indices = @transform_8, window_bounds = array<i64: 9, 32, 1>}, {pipeline_mode = #tpu.pipeline_mode<synchronous>, transform_indices = @transform_9, window_bounds = array<i64: 128, 32>}, {transform_indices = @transform_10, window_bounds = array<i64: 1, 32, 256>}, {transform_indices = @transform_11, window_bounds = array<i64: 1, 32, 256>}]} {
    %0 = tpu.iota {dimensions = array<i32: 1>} : vector<1x256xi32>
    %c16_i32 = arith.constant 16 : i32
    %c0_i32 = arith.constant 0 : i32
    %1 = arith.cmpi eq, %c16_i32, %c0_i32 : i32
    %c1_i32 = arith.constant 1 : i32
    %2 = arith.select %1, %c1_i32, %c16_i32 : i32
    %3 = vector.broadcast %2 : i32 to vector<1x256xi32>
    %4 = arith.remsi %0, %3 : vector<1x256xi32>
    %c0_i32_0 = arith.constant 0 : i32
    %5 = vector.broadcast %c0_i32_0 : i32 to vector<1x256xi32>
    %6 = arith.cmpi ne, %4, %5 : vector<1x256xi32>
    %c0_i32_1 = arith.constant 0 : i32
    %7 = vector.broadcast %c0_i32_1 : i32 to vector<1x256xi32>
    %8 = arith.cmpi slt, %4, %7 : vector<1x256xi32>
    %c0_i32_2 = arith.constant 0 : i32
    %9 = arith.cmpi slt, %2, %c0_i32_2 : i32
    %10 = vector.broadcast %9 : i1 to vector<1x256xi1>
    %11 = vector.broadcast %10 : vector<1x256xi1> to vector<1x256xi1>
    %12 = arith.xori %8, %11 : vector<1x256xi1>
    %13 = arith.andi %12, %6 : vector<1x256xi1>
    %14 = vector.broadcast %2 : i32 to vector<1x256xi32>
    %15 = arith.addi %4, %14 : vector<1x256xi32>
    %16 = arith.select %13, %15, %4 : vector<1x256xi1>, vector<1x256xi32>
    %c0_i32_3 = arith.constant 0 : i32
    %17 = vector.broadcast %c0_i32_3 : i32 to vector<1x256xi32>
    %18 = arith.cmpi sgt, %16, %17 : vector<1x256xi32>
    %19 = arith.extui %18 : vector<1x256xi1> to vector<1x256xi32>
    %20 = arith.sitofp %19 : vector<1x256xi32> to vector<1x256xf32>
    %c15_i32 = arith.constant 15 : i32
    %21 = vector.broadcast %c15_i32 : i32 to vector<1x256xi32>
    %22 = arith.cmpi slt, %16, %21 : vector<1x256xi32>
    %23 = arith.extui %22 : vector<1x256xi1> to vector<1x256xi32>
    %24 = arith.sitofp %23 : vector<1x256xi32> to vector<1x256xf32>
    %c16_i32_4 = arith.constant 16 : i32
    %25 = vector.broadcast %c16_i32_4 : i32 to vector<1x256xi32>
    %26 = arith.cmpi sge, %0, %25 : vector<1x256xi32>
    %27 = arith.extui %26 : vector<1x256xi1> to vector<1x256xi32>
    %28 = arith.sitofp %27 : vector<1x256xi32> to vector<1x256xf32>
    %c240_i32 = arith.constant 240 : i32
    %29 = vector.broadcast %c240_i32 : i32 to vector<1x256xi32>
    %30 = arith.cmpi slt, %0, %29 : vector<1x256xi32>
    %31 = arith.extui %30 : vector<1x256xi1> to vector<1x256xi32>
    %32 = arith.sitofp %31 : vector<1x256xi32> to vector<1x256xf32>
    %33 = arith.mulf %28, %20 : vector<1x256xf32>
    %34 = arith.mulf %28, %24 : vector<1x256xf32>
    %35 = arith.mulf %32, %20 : vector<1x256xf32>
    %36 = arith.mulf %32, %24 : vector<1x256xf32>
    %c0 = arith.constant 0 : index
    %c0_5 = arith.constant 0 : index
    %c0_6 = arith.constant 0 : index
    %37 = vector.load %arg1[%c0, %c0_5, %c0_6] : memref<1x8x256xf32, #tpu.memory_space<vmem>>, vector<1x8x256xf32>
    %38 = vector.shape_cast %37 : vector<1x8x256xf32> to vector<8x256xf32>
    %c0_7 = arith.constant 0 : index
    %c0_8 = arith.constant 0 : index
    %39 = vector.load %arg5[%c0_7, %c0_8] : memref<8x1xf32, #tpu.memory_space<vmem>>, vector<8x1xf32>
    %c4 = arith.constant 4 : index
    %c0_9 = arith.constant 0 : index
    %c0_10 = arith.constant 0 : index
    %40 = vector.load %arg4[%c4, %c0_9, %c0_10] : memref<9x8x1xf32, #tpu.memory_space<vmem>>, vector<1x8x1xf32>
    %41 = vector.shape_cast %40 : vector<1x8x1xf32> to vector<8x1xf32>
    %42 = vector.broadcast %41 : vector<8x1xf32> to vector<8x256xf32>
    %43 = arith.mulf %38, %42 : vector<8x256xf32>
    %44 = vector.broadcast %39 : vector<8x1xf32> to vector<8x256xf32>
    %45 = arith.addf %43, %44 : vector<8x256xf32>
    %c17_i32 = arith.constant 17 : i32
    %46 = tpu.dynamic_rotate %38 by %c17_i32 dim 1 : vector<8x256xf32>, i32 -> vector<8x256xf32>
    %47 = vector.broadcast %33 : vector<1x256xf32> to vector<8x256xf32>
    %48 = arith.mulf %46, %47 : vector<8x256xf32>
    %c0_11 = arith.constant 0 : index
    %c0_12 = arith.constant 0 : index
    %c0_13 = arith.constant 0 : index
    %49 = vector.load %arg4[%c0_11, %c0_12, %c0_13] : memref<9x8x1xf32, #tpu.memory_space<vmem>>, vector<1x8x1xf32>
    %50 = vector.shape_cast %49 : vector<1x8x1xf32> to vector<8x1xf32>
    %51 = vector.broadcast %50 : vector<8x1xf32> to vector<8x256xf32>
    %52 = arith.mulf %48, %51 : vector<8x256xf32>
    %53 = arith.addf %45, %52 : vector<8x256xf32>
    %c16_i32_14 = arith.constant 16 : i32
    %54 = tpu.dynamic_rotate %38 by %c16_i32_14 dim 1 : vector<8x256xf32>, i32 -> vector<8x256xf32>
    %55 = vector.broadcast %28 : vector<1x256xf32> to vector<8x256xf32>
    %56 = arith.mulf %54, %55 : vector<8x256xf32>
    %c1 = arith.constant 1 : index
    %c0_15 = arith.constant 0 : index
    %c0_16 = arith.constant 0 : index
    %57 = vector.load %arg4[%c1, %c0_15, %c0_16] : memref<9x8x1xf32, #tpu.memory_space<vmem>>, vector<1x8x1xf32>
    %58 = vector.shape_cast %57 : vector<1x8x1xf32> to vector<8x1xf32>
    %59 = vector.broadcast %58 : vector<8x1xf32> to vector<8x256xf32>
    %60 = arith.mulf %56, %59 : vector<8x256xf32>
    %61 = arith.addf %53, %60 : vector<8x256xf32>
    %c15_i32_17 = arith.constant 15 : i32
    %62 = tpu.dynamic_rotate %38 by %c15_i32_17 dim 1 : vector<8x256xf32>, i32 -> vector<8x256xf32>
    %63 = vector.broadcast %34 : vector<1x256xf32> to vector<8x256xf32>
    %64 = arith.mulf %62, %63 : vector<8x256xf32>
    %c2 = arith.constant 2 : index
    %c0_18 = arith.constant 0 : index
    %c0_19 = arith.constant 0 : index
    %65 = vector.load %arg4[%c2, %c0_18, %c0_19] : memref<9x8x1xf32, #tpu.memory_space<vmem>>, vector<1x8x1xf32>
    %66 = vector.shape_cast %65 : vector<1x8x1xf32> to vector<8x1xf32>
    %67 = vector.broadcast %66 : vector<8x1xf32> to vector<8x256xf32>
    %68 = arith.mulf %64, %67 : vector<8x256xf32>
    %69 = arith.addf %61, %68 : vector<8x256xf32>
    %c1_i32_20 = arith.constant 1 : i32
    %70 = tpu.dynamic_rotate %38 by %c1_i32_20 dim 1 : vector<8x256xf32>, i32 -> vector<8x256xf32>
    %71 = vector.broadcast %20 : vector<1x256xf32> to vector<8x256xf32>
    %72 = arith.mulf %70, %71 : vector<8x256xf32>
    %c3 = arith.constant 3 : index
    %c0_21 = arith.constant 0 : index
    %c0_22 = arith.constant 0 : index
    %73 = vector.load %arg4[%c3, %c0_21, %c0_22] : memref<9x8x1xf32, #tpu.memory_space<vmem>>, vector<1x8x1xf32>
    %74 = vector.shape_cast %73 : vector<1x8x1xf32> to vector<8x1xf32>
    %75 = vector.broadcast %74 : vector<8x1xf32> to vector<8x256xf32>
    %76 = arith.mulf %72, %75 : vector<8x256xf32>
    %77 = arith.addf %69, %76 : vector<8x256xf32>
    %c255_i32 = arith.constant 255 : i32
    %78 = tpu.dynamic_rotate %38 by %c255_i32 dim 1 : vector<8x256xf32>, i32 -> vector<8x256xf32>
    %79 = vector.broadcast %24 : vector<1x256xf32> to vector<8x256xf32>
    %80 = arith.mulf %78, %79 : vector<8x256xf32>
    %c5 = arith.constant 5 : index
    %c0_23 = arith.constant 0 : index
    %c0_24 = arith.constant 0 : index
    %81 = vector.load %arg4[%c5, %c0_23, %c0_24] : memref<9x8x1xf32, #tpu.memory_space<vmem>>, vector<1x8x1xf32>
    %82 = vector.shape_cast %81 : vector<1x8x1xf32> to vector<8x1xf32>
    %83 = vector.broadcast %82 : vector<8x1xf32> to vector<8x256xf32>
    %84 = arith.mulf %80, %83 : vector<8x256xf32>
    %85 = arith.addf %77, %84 : vector<8x256xf32>
    %c241_i32 = arith.constant 241 : i32
    %86 = tpu.dynamic_rotate %38 by %c241_i32 dim 1 : vector<8x256xf32>, i32 -> vector<8x256xf32>
    %87 = vector.broadcast %35 : vector<1x256xf32> to vector<8x256xf32>
    %88 = arith.mulf %86, %87 : vector<8x256xf32>
    %c6 = arith.constant 6 : index
    %c0_25 = arith.constant 0 : index
    %c0_26 = arith.constant 0 : index
    %89 = vector.load %arg4[%c6, %c0_25, %c0_26] : memref<9x8x1xf32, #tpu.memory_space<vmem>>, vector<1x8x1xf32>
    %90 = vector.shape_cast %89 : vector<1x8x1xf32> to vector<8x1xf32>
    %91 = vector.broadcast %90 : vector<8x1xf32> to vector<8x256xf32>
    %92 = arith.mulf %88, %91 : vector<8x256xf32>
    %93 = arith.addf %85, %92 : vector<8x256xf32>
    %c240_i32_27 = arith.constant 240 : i32
    %94 = tpu.dynamic_rotate %38 by %c240_i32_27 dim 1 : vector<8x256xf32>, i32 -> vector<8x256xf32>
    %95 = vector.broadcast %32 : vector<1x256xf32> to vector<8x256xf32>
    %96 = arith.mulf %94, %95 : vector<8x256xf32>
    %c7 = arith.constant 7 : index
    %c0_28 = arith.constant 0 : index
    %c0_29 = arith.constant 0 : index
    %97 = vector.load %arg4[%c7, %c0_28, %c0_29] : memref<9x8x1xf32, #tpu.memory_space<vmem>>, vector<1x8x1xf32>
    %98 = vector.shape_cast %97 : vector<1x8x1xf32> to vector<8x1xf32>
    %99 = vector.broadcast %98 : vector<8x1xf32> to vector<8x256xf32>
    %100 = arith.mulf %96, %99 : vector<8x256xf32>
    %101 = arith.addf %93, %100 : vector<8x256xf32>
    %c239_i32 = arith.constant 239 : i32
    %102 = tpu.dynamic_rotate %38 by %c239_i32 dim 1 : vector<8x256xf32>, i32 -> vector<8x256xf32>
    %103 = vector.broadcast %36 : vector<1x256xf32> to vector<8x256xf32>
    %104 = arith.mulf %102, %103 : vector<8x256xf32>
    %c8 = arith.constant 8 : index
    %c0_30 = arith.constant 0 : index
    %c0_31 = arith.constant 0 : index
    %105 = vector.load %arg4[%c8, %c0_30, %c0_31] : memref<9x8x1xf32, #tpu.memory_space<vmem>>, vector<1x8x1xf32>
    %106 = vector.shape_cast %105 : vector<1x8x1xf32> to vector<8x1xf32>
    %107 = vector.broadcast %106 : vector<8x1xf32> to vector<8x256xf32>
    %108 = arith.mulf %104, %107 : vector<8x256xf32>
    %109 = arith.addf %101, %108 : vector<8x256xf32>
    %c0_32 = arith.constant 0 : index
    %c0_33 = arith.constant 0 : index
    %110 = vector.load %arg6[%c0_32, %c0_33] : memref<32x8xbf16, #tpu.memory_space<vmem>>, vector<32x8xbf16>
    %111 = arith.truncf %109 : vector<8x256xf32> to vector<8x256xbf16>
    %cst = arith.constant dense<0.000000e+00> : vector<32x256xf32>
    %112 = tpu.matmul %110, %111, %cst {dimension_numbers = #tpu.dot_dimension_numbers<[1], [0], [0], [1], [0, 0, 1, 1], [], []>} : vector<32x8xbf16>, vector<8x256xbf16>, vector<32x256xf32> -> vector<32x256xf32>
    %c0_34 = arith.constant 0 : index
    %c0_35 = arith.constant 0 : index
    %113 = vector.load %arg7[%c0_34, %c0_35] : memref<32x32xbf16, #tpu.memory_space<vmem>>, vector<32x32xbf16>
    %c0_36 = arith.constant 0 : index
    %c0_37 = arith.constant 0 : index
    %c0_38 = arith.constant 0 : index
    %114 = vector.load %arg2[%c0_36, %c0_37, %c0_38] : memref<1x32x256xf32, #tpu.memory_space<vmem>>, vector<1x32x256xf32>
    %115 = vector.shape_cast %114 : vector<1x32x256xf32> to vector<32x256xf32>
    %116 = arith.truncf %115 : vector<32x256xf32> to vector<32x256xbf16>
    %cst_39 = arith.constant dense<0.000000e+00> : vector<32x256xf32>
    %117 = tpu.matmul %113, %116, %cst_39 {dimension_numbers = #tpu.dot_dimension_numbers<[1], [0], [0], [1], [0, 0, 1, 1], [], []>} : vector<32x32xbf16>, vector<32x256xbf16>, vector<32x256xf32> -> vector<32x256xf32>
    %118 = arith.addf %112, %117 : vector<32x256xf32>
    %c0_40 = arith.constant 0 : index
    %c0_41 = arith.constant 0 : index
    %119 = vector.load %arg8[%c0_40, %c0_41] : memref<32x1xf32, #tpu.memory_space<vmem>>, vector<32x1xf32>
    %120 = vector.broadcast %119 : vector<32x1xf32> to vector<32x256xf32>
    %121 = arith.addf %118, %120 : vector<32x256xf32>
    %c4_42 = arith.constant 4 : index
    %c0_43 = arith.constant 0 : index
    %c0_44 = arith.constant 0 : index
    %122 = vector.load %arg9[%c4_42, %c0_43, %c0_44] : memref<9x32x1xf32, #tpu.memory_space<vmem>>, vector<1x32x1xf32>
    %123 = vector.shape_cast %122 : vector<1x32x1xf32> to vector<32x1xf32>
    %124 = vector.broadcast %123 : vector<32x1xf32> to vector<32x256xf32>
    %125 = arith.mulf %121, %124 : vector<32x256xf32>
    %c17_i32_45 = arith.constant 17 : i32
    %126 = tpu.dynamic_rotate %121 by %c17_i32_45 dim 1 : vector<32x256xf32>, i32 -> vector<32x256xf32>
    %127 = vector.broadcast %33 : vector<1x256xf32> to vector<32x256xf32>
    %128 = arith.mulf %126, %127 : vector<32x256xf32>
    %c0_46 = arith.constant 0 : index
    %c0_47 = arith.constant 0 : index
    %c0_48 = arith.constant 0 : index
    %129 = vector.load %arg9[%c0_46, %c0_47, %c0_48] : memref<9x32x1xf32, #tpu.memory_space<vmem>>, vector<1x32x1xf32>
    %130 = vector.shape_cast %129 : vector<1x32x1xf32> to vector<32x1xf32>
    %131 = vector.broadcast %130 : vector<32x1xf32> to vector<32x256xf32>
    %132 = arith.mulf %128, %131 : vector<32x256xf32>
    %133 = arith.addf %125, %132 : vector<32x256xf32>
    %c16_i32_49 = arith.constant 16 : i32
    %134 = tpu.dynamic_rotate %121 by %c16_i32_49 dim 1 : vector<32x256xf32>, i32 -> vector<32x256xf32>
    %135 = vector.broadcast %28 : vector<1x256xf32> to vector<32x256xf32>
    %136 = arith.mulf %134, %135 : vector<32x256xf32>
    %c1_50 = arith.constant 1 : index
    %c0_51 = arith.constant 0 : index
    %c0_52 = arith.constant 0 : index
    %137 = vector.load %arg9[%c1_50, %c0_51, %c0_52] : memref<9x32x1xf32, #tpu.memory_space<vmem>>, vector<1x32x1xf32>
    %138 = vector.shape_cast %137 : vector<1x32x1xf32> to vector<32x1xf32>
    %139 = vector.broadcast %138 : vector<32x1xf32> to vector<32x256xf32>
    %140 = arith.mulf %136, %139 : vector<32x256xf32>
    %141 = arith.addf %133, %140 : vector<32x256xf32>
    %c15_i32_53 = arith.constant 15 : i32
    %142 = tpu.dynamic_rotate %121 by %c15_i32_53 dim 1 : vector<32x256xf32>, i32 -> vector<32x256xf32>
    %143 = vector.broadcast %34 : vector<1x256xf32> to vector<32x256xf32>
    %144 = arith.mulf %142, %143 : vector<32x256xf32>
    %c2_54 = arith.constant 2 : index
    %c0_55 = arith.constant 0 : index
    %c0_56 = arith.constant 0 : index
    %145 = vector.load %arg9[%c2_54, %c0_55, %c0_56] : memref<9x32x1xf32, #tpu.memory_space<vmem>>, vector<1x32x1xf32>
    %146 = vector.shape_cast %145 : vector<1x32x1xf32> to vector<32x1xf32>
    %147 = vector.broadcast %146 : vector<32x1xf32> to vector<32x256xf32>
    %148 = arith.mulf %144, %147 : vector<32x256xf32>
    %149 = arith.addf %141, %148 : vector<32x256xf32>
    %c1_i32_57 = arith.constant 1 : i32
    %150 = tpu.dynamic_rotate %121 by %c1_i32_57 dim 1 : vector<32x256xf32>, i32 -> vector<32x256xf32>
    %151 = vector.broadcast %20 : vector<1x256xf32> to vector<32x256xf32>
    %152 = arith.mulf %150, %151 : vector<32x256xf32>
    %c3_58 = arith.constant 3 : index
    %c0_59 = arith.constant 0 : index
    %c0_60 = arith.constant 0 : index
    %153 = vector.load %arg9[%c3_58, %c0_59, %c0_60] : memref<9x32x1xf32, #tpu.memory_space<vmem>>, vector<1x32x1xf32>
    %154 = vector.shape_cast %153 : vector<1x32x1xf32> to vector<32x1xf32>
    %155 = vector.broadcast %154 : vector<32x1xf32> to vector<32x256xf32>
    %156 = arith.mulf %152, %155 : vector<32x256xf32>
    %157 = arith.addf %149, %156 : vector<32x256xf32>
    %c255_i32_61 = arith.constant 255 : i32
    %158 = tpu.dynamic_rotate %121 by %c255_i32_61 dim 1 : vector<32x256xf32>, i32 -> vector<32x256xf32>
    %159 = vector.broadcast %24 : vector<1x256xf32> to vector<32x256xf32>
    %160 = arith.mulf %158, %159 : vector<32x256xf32>
    %c5_62 = arith.constant 5 : index
    %c0_63 = arith.constant 0 : index
    %c0_64 = arith.constant 0 : index
    %161 = vector.load %arg9[%c5_62, %c0_63, %c0_64] : memref<9x32x1xf32, #tpu.memory_space<vmem>>, vector<1x32x1xf32>
    %162 = vector.shape_cast %161 : vector<1x32x1xf32> to vector<32x1xf32>
    %163 = vector.broadcast %162 : vector<32x1xf32> to vector<32x256xf32>
    %164 = arith.mulf %160, %163 : vector<32x256xf32>
    %165 = arith.addf %157, %164 : vector<32x256xf32>
    %c241_i32_65 = arith.constant 241 : i32
    %166 = tpu.dynamic_rotate %121 by %c241_i32_65 dim 1 : vector<32x256xf32>, i32 -> vector<32x256xf32>
    %167 = vector.broadcast %35 : vector<1x256xf32> to vector<32x256xf32>
    %168 = arith.mulf %166, %167 : vector<32x256xf32>
    %c6_66 = arith.constant 6 : index
    %c0_67 = arith.constant 0 : index
    %c0_68 = arith.constant 0 : index
    %169 = vector.load %arg9[%c6_66, %c0_67, %c0_68] : memref<9x32x1xf32, #tpu.memory_space<vmem>>, vector<1x32x1xf32>
    %170 = vector.shape_cast %169 : vector<1x32x1xf32> to vector<32x1xf32>
    %171 = vector.broadcast %170 : vector<32x1xf32> to vector<32x256xf32>
    %172 = arith.mulf %168, %171 : vector<32x256xf32>
    %173 = arith.addf %165, %172 : vector<32x256xf32>
    %c240_i32_69 = arith.constant 240 : i32
    %174 = tpu.dynamic_rotate %121 by %c240_i32_69 dim 1 : vector<32x256xf32>, i32 -> vector<32x256xf32>
    %175 = vector.broadcast %32 : vector<1x256xf32> to vector<32x256xf32>
    %176 = arith.mulf %174, %175 : vector<32x256xf32>
    %c7_70 = arith.constant 7 : index
    %c0_71 = arith.constant 0 : index
    %c0_72 = arith.constant 0 : index
    %177 = vector.load %arg9[%c7_70, %c0_71, %c0_72] : memref<9x32x1xf32, #tpu.memory_space<vmem>>, vector<1x32x1xf32>
    %178 = vector.shape_cast %177 : vector<1x32x1xf32> to vector<32x1xf32>
    %179 = vector.broadcast %178 : vector<32x1xf32> to vector<32x256xf32>
    %180 = arith.mulf %176, %179 : vector<32x256xf32>
    %181 = arith.addf %173, %180 : vector<32x256xf32>
    %c239_i32_73 = arith.constant 239 : i32
    %182 = tpu.dynamic_rotate %121 by %c239_i32_73 dim 1 : vector<32x256xf32>, i32 -> vector<32x256xf32>
    %183 = vector.broadcast %36 : vector<1x256xf32> to vector<32x256xf32>
    %184 = arith.mulf %182, %183 : vector<32x256xf32>
    %c8_74 = arith.constant 8 : index
    %c0_75 = arith.constant 0 : index
    %c0_76 = arith.constant 0 : index
    %185 = vector.load %arg9[%c8_74, %c0_75, %c0_76] : memref<9x32x1xf32, #tpu.memory_space<vmem>>, vector<1x32x1xf32>
    %186 = vector.shape_cast %185 : vector<1x32x1xf32> to vector<32x1xf32>
    %187 = vector.broadcast %186 : vector<32x1xf32> to vector<32x256xf32>
    %188 = arith.mulf %184, %187 : vector<32x256xf32>
    %189 = arith.addf %181, %188 : vector<32x256xf32>
    %cst_77 = arith.constant 0.000000e+00 : f32
    %cst_78 = arith.constant 6.000000e+00 : f32
    %190 = vector.broadcast %cst_77 : f32 to vector<32x256xf32>
    %191 = arith.maximumf %190, %189 : vector<32x256xf32>
    %192 = vector.broadcast %cst_78 : f32 to vector<32x256xf32>
    %193 = arith.minimumf %192, %191 : vector<32x256xf32>
    %c0_79 = arith.constant 0 : index
    %c0_80 = arith.constant 0 : index
    %194 = vector.load %arg10[%c0_79, %c0_80] : memref<128x32xbf16, #tpu.memory_space<vmem>>, vector<128x32xbf16>
    %195 = arith.truncf %193 : vector<32x256xf32> to vector<32x256xbf16>
    %cst_81 = arith.constant dense<0.000000e+00> : vector<128x256xf32>
    %196 = tpu.matmul %194, %195, %cst_81 {dimension_numbers = #tpu.dot_dimension_numbers<[1], [0], [0], [1], [0, 0, 1, 1], [], []>} : vector<128x32xbf16>, vector<32x256xbf16>, vector<128x256xf32> -> vector<128x256xf32>
    %197 = vector.extract_strided_slice %196 {offsets = [0, 0], sizes = [96, 256], strides = [1, 1]} : vector<128x256xf32> to vector<96x256xf32>
    %cst_82 = arith.constant 0.000000e+00 : f32
    %198 = vector.broadcast %cst_82 : f32 to vector<96x256xf32>
    %199 = arith.subf %198, %197 : vector<96x256xf32>
    %200 = math.exp %199 : vector<96x256xf32>
    %cst_83 = arith.constant 1.000000e+00 : f32
    %201 = vector.broadcast %cst_83 : f32 to vector<96x256xf32>
    %202 = arith.addf %201, %200 : vector<96x256xf32>
    %203 = tpu.reciprocal %202 {approx = true} : vector<96x256xf32> -> vector<96x256xf32>
    %204 = vector.extract_strided_slice %203 {offsets = [0, 0], sizes = [32, 256], strides = [1, 1]} : vector<96x256xf32> to vector<32x256xf32>
    %205 = vector.extract_strided_slice %203 {offsets = [32, 0], sizes = [32, 256], strides = [1, 1]} : vector<96x256xf32> to vector<32x256xf32>
    %206 = vector.extract_strided_slice %203 {offsets = [64, 0], sizes = [32, 256], strides = [1, 1]} : vector<96x256xf32> to vector<32x256xf32>
    %207 = vector.extract_strided_slice %196 {offsets = [96, 0], sizes = [32, 256], strides = [1, 1]} : vector<128x256xf32> to vector<32x256xf32>
    %cst_84 = arith.constant 0.000000e+00 : f32
    %cst_85 = arith.constant 6.000000e+00 : f32
    %208 = vector.broadcast %cst_84 : f32 to vector<32x256xf32>
    %209 = arith.maximumf %208, %207 : vector<32x256xf32>
    %210 = vector.broadcast %cst_85 : f32 to vector<32x256xf32>
    %211 = arith.minimumf %210, %209 : vector<32x256xf32>
    %c0_86 = arith.constant 0 : index
    %c0_87 = arith.constant 0 : index
    %c0_88 = arith.constant 0 : index
    %212 = vector.load %arg3[%c0_86, %c0_87, %c0_88] : memref<1x32x256xf32, #tpu.memory_space<vmem>>, vector<1x32x256xf32>
    %213 = vector.shape_cast %212 : vector<1x32x256xf32> to vector<32x256xf32>
    %214 = arith.mulf %205, %213 : vector<32x256xf32>
    %215 = arith.mulf %204, %211 : vector<32x256xf32>
    %216 = arith.addf %214, %215 : vector<32x256xf32>
    %cst_89 = arith.constant 0.000000e+00 : f32
    %cst_90 = arith.constant 6.000000e+00 : f32
    %217 = vector.broadcast %cst_89 : f32 to vector<32x256xf32>
    %218 = arith.maximumf %217, %216 : vector<32x256xf32>
    %219 = vector.broadcast %cst_90 : f32 to vector<32x256xf32>
    %220 = arith.minimumf %219, %218 : vector<32x256xf32>
    %221 = arith.mulf %206, %220 : vector<32x256xf32>
    %c0_91 = arith.constant 0 : index
    %c0_92 = arith.constant 0 : index
    %c0_93 = arith.constant 0 : index
    %222 = vector.load %arg12[%c0_91, %c0_92, %c0_93] : memref<1x32x256xf32, #tpu.memory_space<vmem>>, vector<1x32x256xf32>
    %223 = vector.shape_cast %222 : vector<1x32x256xf32> to vector<32x256xf32>
    %224 = vector.shape_cast %216 : vector<32x256xf32> to vector<1x32x256xf32>
    tpu.vector_store %arg12[%c0_91, %c0_92, %c0_93], %224 {strides = array<i32>} : memref<1x32x256xf32, #tpu.memory_space<vmem>>, vector<1x32x256xf32>,
    %c0_94 = arith.constant 0 : index
    %c0_95 = arith.constant 0 : index
    %c0_96 = arith.constant 0 : index
    %225 = vector.load %arg11[%c0_94, %c0_95, %c0_96] : memref<1x32x256xf32, #tpu.memory_space<vmem>>, vector<1x32x256xf32>
    %226 = vector.shape_cast %225 : vector<1x32x256xf32> to vector<32x256xf32>
    %227 = vector.shape_cast %221 : vector<32x256xf32> to vector<1x32x256xf32>
    tpu.vector_store %arg11[%c0_94, %c0_95, %c0_96], %227 {strides = array<i32>} : memref<1x32x256xf32, #tpu.memory_space<vmem>>, vector<1x32x256xf32>,
    return
  }
  func.func @transform_0(%arg0: i32) -> (i32, i32, i32) {
    %c0_i32 = arith.constant 0 : i32
    %c0_i32_0 = arith.constant 0 : i32
    %c0_i32_1 = arith.constant 0 : i32
    return %arg0, %c0_i32, %c0_i32_0 : i32, i32, i32
  }
  func.func @transform_1(%arg0: i32) -> (i32, i32, i32) {
    %c0_i32 = arith.constant 0 : i32
    %c0_i32_0 = arith.constant 0 : i32
    %c0_i32_1 = arith.constant 0 : i32
    return %arg0, %c0_i32, %c0_i32_0 : i32, i32, i32
  }
  func.func @transform_2(%arg0: i32) -> (i32, i32, i32) {
    %c0_i32 = arith.constant 0 : i32
    %c0_i32_0 = arith.constant 0 : i32
    %c0_i32_1 = arith.constant 0 : i32
    return %arg0, %c0_i32, %c0_i32_0 : i32, i32, i32
  }
  func.func @transform_3(%arg0: i32) -> (i32, i32, i32) {
    %c0_i32 = arith.constant 0 : i32
    %c0_i32_0 = arith.constant 0 : i32
    %c0_i32_1 = arith.constant 0 : i32
    %c0_i32_2 = arith.constant 0 : i32
    return %c0_i32, %c0_i32_0, %c0_i32_1 : i32, i32, i32
  }
  func.func @transform_4(%arg0: i32) -> (i32, i32) {
    %c0_i32 = arith.constant 0 : i32
    %c0_i32_0 = arith.constant 0 : i32
    %c0_i32_1 = arith.constant 0 : i32
    return %c0_i32, %c0_i32_0 : i32, i32
  }
  func.func @transform_5(%arg0: i32) -> (i32, i32) {
    %c0_i32 = arith.constant 0 : i32
    %c0_i32_0 = arith.constant 0 : i32
    %c0_i32_1 = arith.constant 0 : i32
    return %c0_i32, %c0_i32_0 : i32, i32
  }
  func.func @transform_6(%arg0: i32) -> (i32, i32) {
    %c0_i32 = arith.constant 0 : i32
    %c0_i32_0 = arith.constant 0 : i32
    %c0_i32_1 = arith.constant 0 : i32
    return %c0_i32, %c0_i32_0 : i32, i32
  }
  func.func @transform_7(%arg0: i32) -> (i32, i32) {
    %c0_i32 = arith.constant 0 : i32
    %c0_i32_0 = arith.constant 0 : i32
    %c0_i32_1 = arith.constant 0 : i32
    return %c0_i32, %c0_i32_0 : i32, i32
  }
  func.func @transform_8(%arg0: i32) -> (i32, i32, i32) {
    %c0_i32 = arith.constant 0 : i32
    %c0_i32_0 = arith.constant 0 : i32
    %c0_i32_1 = arith.constant 0 : i32
    %c0_i32_2 = arith.constant 0 : i32
    return %c0_i32, %c0_i32_0, %c0_i32_1 : i32, i32, i32
  }
  func.func @transform_9(%arg0: i32) -> (i32, i32) {
    %c0_i32 = arith.constant 0 : i32
    %c0_i32_0 = arith.constant 0 : i32
    %c0_i32_1 = arith.constant 0 : i32
    return %c0_i32, %c0_i32_0 : i32, i32
  }
  func.func @transform_10(%arg0: i32) -> (i32, i32, i32) {
    %c0_i32 = arith.constant 0 : i32
    %c0_i32_0 = arith.constant 0 : i32
    %c0_i32_1 = arith.constant 0 : i32
    return %arg0, %c0_i32, %c0_i32_0 : i32, i32, i32
  }
  func.func @transform_11(%arg0: i32) -> (i32, i32, i32) {
    %c0_i32 = arith.constant 0 : i32
    %c0_i32_0 = arith.constant 0 : i32
    %c0_i32_1 = arith.constant 0 : i32
    return %arg0, %c0_i32, %c0_i32_0 : i32, i32, i32
  }
}

</mosaic_0001>

<bundles_post_ra>
// kernel: squeeze.7
= control target key start
LH: loop header
LB: loop body
LE: loop exit
PB: predicated region body
PF: predicated region fallthrough
CT: control target
= control target key end

     0   :  { %vm17_vm0 = vcmask 64512   ;;  %s62_s0 = inlined_call_operand.vmem [shape: f32[8,3,3], index: 0, kind: input, shape index: {}]   ;;  %s63_s1 = inlined_call_operand.vmem [shape: f32[8,9], index: 1, kind: output, shape index: {}]  }
   0x1   :  { %v30_v0 = vld [vmem:[%s62_s0 + $0x8] sm:$0xf]  ;;  %v31_v1 = vld [vmem:[%s62_s0 + $0x4] sm:$0xf]  ;;  %v14_v2 = vld [vmem:[%s62_s0] sm:$0xf] }
   0x2   :  { %9 = vst [vmem:[#allocation0] sm:$0xf] %v30_v0  ;;  %13 = vst [vmem:[#allocation0 + $0x10] sm:$0xf] %v31_v1 }
   0x3   :  { %15 = vst [vmem:[#allocation0 + $0x8] sm:$0xf] %v14_v2 }
   0x9   :  { %v20_v4 = vld [vmem:[#allocation0 + $0x10] sm:$0x7]   ;;  %v25_v5 = vld [vmem:[#allocation0] sm:$0x7]  }
   0xa   :  { %v16_v3 = vld [vmem:[#allocation0 + $0x8] sm:$0x7]   ;;  %32 = vst.msk [vmem:[%s63_s1 + $0x3] sm:$0x7] %vm17_vm0, %v20_v4   ;;  %33 = vst.msk [vmem:[%s63_s1 + $0x6] sm:$0x7] %vm17_vm0, %v25_v5  }
   0xb   :  { %18 = vst.msk [vmem:[%s63_s1] sm:$0x7] %vm17_vm0, %v16_v3  }

// kernel: squeeze.8
= control target key start
LH: loop header
LB: loop body
LE: loop exit
PB: predicated region body
PF: predicated region fallthrough
CT: control target
= control target key end

     0   :  { %vm17_vm0 = vcmask 261120   ;;  %s62_s0 = inlined_call_operand.vmem [shape: f32[32,3,3], index: 0, kind: input, shape index: {}]   ;;  %s63_s1 = inlined_call_operand.vmem [shape: f32[32,9], index: 1, kind: output, shape index: {}]  }
   0x1   :  { %v30_v0 = vld [vmem:[%s62_s0 + $0x8] sm:$0xf]  ;;  %v31_v1 = vld [vmem:[%s62_s0 + $0x4] sm:$0xf]  ;;  %v14_v2 = vld [vmem:[%s62_s0] sm:$0xf] }
   0x2   :  { %9 = vst [vmem:[#allocation0] sm:$0xf] %v30_v0  ;;  %13 = vst [vmem:[#allocation0 + $0x10] sm:$0xf] %v31_v1 }
   0x3   :  { %15 = vst [vmem:[#allocation0 + $0x8] sm:$0xf] %v14_v2 }
   0x9   :  { %v20_v4 = vld [vmem:[#allocation0 + $0x10] sm:$0x7]   ;;  %v25_v5 = vld [vmem:[#allocation0] sm:$0x7]  }
   0xa   :  { %v16_v3 = vld [vmem:[#allocation0 + $0x8] sm:$0x7]   ;;  %32 = vst.msk [vmem:[%s63_s1 + $0x3] sm:$0x7] %vm17_vm0, %v20_v4   ;;  %33 = vst.msk [vmem:[%s63_s1 + $0x6] sm:$0x7] %vm17_vm0, %v25_v5  }
   0xb   :  { %18 = vst.msk [vmem:[%s63_s1] sm:$0x7] %vm17_vm0, %v16_v3  }

// kernel: bottleneck_lstm_cell.1
= control target key start
LH: loop header
LB: loop body
LE: loop exit
PB: predicated region body
PF: predicated region fallthrough
CT: control target
= control target key end

     0   :  { %s2333_s17 = smov 0   ;;  %s3415_s0 = inlined_call_operand.vmem [shape: f32[2,8,256], index: 0, kind: input, shape index: {}]   ;;  %s3416_s1 = inlined_call_operand.vmem [shape: f32[2,32,256], index: 1, kind: input, shape index: {}]   ;;  %s3417_s2 = inlined_call_operand.vmem [shape: f32[2,32,256], index: 2, kind: input, shape index: {}]   ;;  %s3418_s3 = inlined_call_operand.vmem [shape: f32[9,8,1], index: 3, kind: input, shape index: {}]   ;;  %s3419_s4 = inlined_call_operand.vmem [shape: f32[8,1], index: 4, kind: input, shape index: {}]   ;;  %s3420_s5 = inlined_call_operand.vmem [shape: bf16[32,8], index: 5, kind: input, shape index: {}]   ;;  %s3421_s6 = inlined_call_operand.vmem [shape: bf16[32,32], index: 6, kind: input, shape index: {}]   ;;  %s3422_s7 = inlined_call_operand.vmem [shape: f32[32,1], index: 7, kind: input, shape index: {}]   ;;  %s3423_s8 = inlined_call_operand.vmem [shape: f32[9,32,1], index: 8, kind: input, shape index: {}]   ;;  %s3424_s9 = inlined_call_operand.vmem [shape: bf16[128,32], index: 9, kind: input, shape index: {}]   ;;  %s3425_s10 = inlined_call_operand.vmem [shape: f32[2,32,256], index: 10, kind: output, shape index: {0}]   ;;  %s3426_s11 = inlined_call_operand.vmem [shape: f32[2,32,256], index: 11, kind: output, shape index: {1}]  }
   0x1 LB: > { %s2028_s18 = sadd.s32 4294967295, %s2261_s17   ;;  %p2032_p0 = scmp.ge.s32.totalorder %s2261_s17, 1  ;;  %s2261_s17 = sphi %s2333_s17, %s22_s17  }
   0x2   : > { %p360_p1 = scmp.lt.s32.totalorder %s2261_s17, 3 }
   0x4   : > { %p361_p2 = pnand %p2032_p0, %p360_p1 }
   0x6   : > { %364 = sbr.rel (%p361_p2) target bundleno = 932 (0x3a4), region = 60 }
   0xb   : > { %v528_v0 = vld [vmem:[%s3418_s3] sm:$0xff]  ;;  %p415_p3 = scmp.lt.s32.totalorder %s2028_s18, 1  ;;  %v3429_v2 = vmov 0   ;;  %s2264_s29 = smov 17   ;;  %v2050_v6 = vld [vmem:[%s3418_s3 + $0x8] sm:$0xff]  ;;  %v2051_v7 = vld [vmem:[%s3418_s3 + $0x10] sm:$0xff] }
   0xc   : > { %v2049_v1 = vld [vmem:[%s3418_s3 + $0x20] sm:$0xff]  ;;  %2146 = vset.pattern.permute.xlu1 %v3429_v2  ;;  %2145 = vset.pattern.permute.xlu0 %v3429_v2  ;;  %s2265_s13 = smov 16   ;;  %v2052_v8 = vld [vmem:[%s3418_s3 + $0x18] sm:$0xff]  ;;  %s2266_s20 = smov 15   ;;  %v2053_v9 = vld [vmem:[%s3418_s3 + $0x28] sm:$0xff]  ;;  %vm710_vm0 = vcmask 261120  }
   0xd   : > { %531 = vperm.xlu1 %2146, %v528_v0   ;;  %507 = vperm.xlu0 %2145, %v2049_v1   ;;  %s3542_s18 = smov (!%p415_p3, %s2028_s18), 1  ;;  %v502_v3 = vld [vmem:[%s3419_s4] sm:$0xff]  ;;  %s2267_s21 = smov 1   ;;  %v2054_v10 = vld [vmem:[%s3418_s3 + $0x30] sm:$0xff]  ;;  %v2055_v22 = vld [vmem:[%s3418_s3 + $0x38] sm:$0xff]  ;;  %vm787_vm15 = vcmask 1043456  }
   0xe   : > { %749 = vmatprep.mubr.bf16.mxu0 %v3429_v2  ;;  %836 = vmatprep.mubr.bf16.mxu1 %v3429_v2  ;;  %s2116_s25 = sshll.u32 %s3542_s18, 4  ;;  %s2268_s24 = smov 127   ;;  %v2147_v24 = vld [vmem:[%s3421_s6] sm:$0xff]   ;;  %v2148_v26 = vld [vmem:[%s3421_s6 + $0x8] sm:$0xff]   ;;  %v849_v27 = vld [vmem:[%s3422_s7 + $0x10] sm:$0xff] }
   0xf   : > { %s419_s28 = scalar_lea.vmem %s3415_s0, %s2116_s25  ;;  %s2395_s25 = sshll.u32 %s3542_s18, 6  ;;  %v2056_v25 = vld [vmem:[%s3418_s3 + $0x40] sm:$0xff]  ;;  %v850_v28 = vld [vmem:[%s3422_s7 + $0x18] sm:$0xff]  ;;  %v848_v30 = vld [vmem:[%s3422_s7 + $0x8] sm:$0xff] }
  0x10   : > { %v2360_v4 = vld [vmem:[%s419_s28] sm:$0xff]  ;;  %v2364_v5 = vld [vmem:[%s419_s28 + $0x8] sm:$0xff]  ;;  %s424_s12 = scalar_lea.vmem %s3416_s1, %s2395_s25  ;;  %s2269_s18 = smov 113   ;;  %v2068_v31 = vld [vmem:[%s3423_s8 + $0x90] sm:$0xff] }
  0x11   : > { %514 = vperm.xlu0 %2145, %v502_v3   ;;  %519 = vrot.lane.b32.xlu1 %v2360_v4, %s2264_s29  ;;  %v693_v11 = vld [vmem:[%s424_s12 + $0x28] sm:$0xff]  ;;  %v695_v12 = vld [vmem:[%s424_s12 + $0x38] sm:$0xff]  ;;  %v692_v14 = vld [vmem:[%s424_s12 + $0x20] sm:$0xff]  ;;  %s2270_s22 = smov 112   ;;  %s3427_s27 = smov 111  }
  0x12   : > { %v699_v13 = vpack.c.bf16 %v695_v12, %v693_v11  ;;  %v694_v15 = vld [vmem:[%s424_s12 + $0x30] sm:$0xff]  ;;  %v689_v17 = vld [vmem:[%s424_s12 + $0x8] sm:$0xff]  ;;  %v691_v18 = vld [vmem:[%s424_s12 + $0x18] sm:$0xff]  ;;  %s3472_s19 = smov 111   ;;  %s3396_s23 = scalar_lea.vmem %s3425_s10, %s2395_s25 }
  0x13   : > { %v698_v16 = vpack.c.bf16 %v694_v15, %v692_v14  ;;  %v697_v19 = vpack.c.bf16 %v691_v18, %v689_v17  ;;  %v688_v20 = vld [vmem:[%s424_s12] sm:$0xff]  ;;  %v690_v21 = vld [vmem:[%s424_s12 + $0x10] sm:$0xff]  ;;  %v2069_v32 = vld [vmem:[%s3423_s8 + $0x98] sm:$0xff] }
  0x14   : > { %729 = vmatprep.subr.bf16.mxu0 %v699_v13  ;;  %v696_v23 = vpack.c.bf16 %v690_v21, %v688_v20  ;;  %v847_v29 = vld [vmem:[%s3422_s7] sm:$0xff]  ;;  %v946_v33 = vld [vmem:[%s3423_s8 + $0x10] sm:$0xff]  ;;  %v947_v34 = vld [vmem:[%s3423_s8 + $0x18] sm:$0xff] }
  0x15   : > { %521 = vrot.lane.b32.xlu0 %v2364_v5, %s2264_s29  ;;  %551 = vperm.xlu1 %2146, %v2050_v6   ;;  %v2072_v35 = vld [vmem:[%s3423_s8 + $0x30] sm:$0xff]  ;;  %v2073_v36 = vld [vmem:[%s3423_s8 + $0x38] sm:$0xff]  ;;  %v2066_v37 = vld [vmem:[%s3423_s8 + $0x80] sm:$0xff] }
  0x16   : > { %730 = vmatpush1.bf16.msra.mxu0 %v698_v16  ;;  %v2067_v38 = vld [vmem:[%s3423_s8 + $0x88] sm:$0xff]  ;;  %v944_v39 = vld [vmem:[%s3423_s8] sm:$0xff]  ;;  %v2076_v41 = vld [vmem:[%s3423_s8 + $0x50] sm:$0xff] }
  0x17   : > { %731 = vmatprep.subr.bf16.mxu0 %v697_v19  ;;  %v945_v40 = vld [vmem:[%s3423_s8 + $0x8] sm:$0xff]  ;;  %v2077_v42 = vld [vmem:[%s3423_s8 + $0x58] sm:$0xff]  ;;  %v2070_v43 = vld [vmem:[%s3423_s8 + $0x20] sm:$0xff] }
  0x18   : > { %v2071_v44 = vld [vmem:[%s3423_s8 + $0x28] sm:$0xff]  ;;  %v2080_v45 = vld [vmem:[%s3423_s8 + $0x70] sm:$0xff]  ;;  %v2081_v46 = vld [vmem:[%s3423_s8 + $0x78] sm:$0xff] }
  0x19   : > { %538 = vrot.lane.b32.xlu0 %v2360_v4, %s2265_s13  ;;  %540 = vrot.lane.b32.xlu1 %v2364_v5, %s2265_s13  ;;  %v2074_v47 = vld [vmem:[%s3423_s8 + $0x40] sm:$0xff]  ;;  %v2075_v48 = vld [vmem:[%s3423_s8 + $0x48] sm:$0xff] }
  0x1a   : > { %732 = vmatpush1.bf16.msra.mxu0 %v696_v23  ;;  %v2084_v49 = vld [vmem:[%s3423_s8 + $0xb0] sm:$0xff]  ;;  %v2085_v50 = vld [vmem:[%s3423_s8 + $0xb8] sm:$0xff]  ;;  %v2078_v51 = vld [vmem:[%s3423_s8 + $0x60] sm:$0xff] }
  0x1b   : > { %v2079_v52 = vld [vmem:[%s3423_s8 + $0x68] sm:$0xff]  ;;  %v2088_v53 = vld [vmem:[%s3423_s8 + $0xd0] sm:$0xff]  ;;  %v2089_v54 = vld [vmem:[%s3423_s8 + $0xd8] sm:$0xff] }
  0x1c   : > { %v2082_v55 = vld [vmem:[%s3423_s8 + $0xa0] sm:$0xff]  ;;  %v2083_v56 = vld [vmem:[%s3423_s8 + $0xa8] sm:$0xff]  ;;  %v2092_v57 = vld [vmem:[%s3423_s8 + $0xf0] sm:$0xff] }
  0x1d   : > { %571 = vperm.xlu0 %2145, %v2051_v7   ;;  %558 = vrot.lane.b32.xlu1 %v2360_v4, %s2266_s20  ;;  %v2093_v58 = vld [vmem:[%s3423_s8 + $0xf8] sm:$0xff]  ;;  %v2086_v59 = vld [vmem:[%s3423_s8 + $0xc0] sm:$0xff]  ;;  %v2087_v60 = vld [vmem:[%s3423_s8 + $0xc8] sm:$0xff] }
  0x1e   : > { %2059 = vmatmul.mubr.msk.bf16.vlgmr.msra.gmra.mxu0 %vm710_vm0, %v2147_v24  ;;  %v2096_v61 = vld [vmem:[%s3423_s8 + $0x110] sm:$0xff]  ;;  %v2097_v62 = vld [vmem:[%s3423_s8 + $0x118] sm:$0xff]  ;;  %v2090_v63 = vld [vmem:[%s3423_s8 + $0xe0] sm:$0xff]  ;;  %v2272_v24 = vmov 0.0  }
  0x1f   : > { %759 = vmatprep.mubr.bf16.mxu0 %v3429_v2  ;;  %v2091_v0 = vld [vmem:[%s3423_s8 + $0xe8] sm:$0xff]  ;;  %v2094_v6 = vld [vmem:[%s3423_s8 + $0x100] sm:$0xff] }
  0x20   : > { %v2095_v7 = vld [vmem:[%s3423_s8 + $0x108] sm:$0xff] }
  0x21   : > { %560 = vrot.lane.b32.xlu0 %v2364_v5, %s2266_s20  ;;  %591 = vperm.xlu1 %2146, %v2052_v8  }
  0x25   : > { %578 = vrot.lane.b32.xlu0 %v2360_v4, %s2267_s21  ;;  %580 = vrot.lane.b32.xlu1 %v2364_v5, %s2267_s21 }
  0x26   : > { %2060 = vmatmul.mubr.msk.bf16.gmra.mxu0 %vm710_vm0, %v2148_v26 }
  0x27   : > { %826 = vmatprep.mubr.bf16.mxu0 %v3429_v2 }
  0x29   : > { %611 = vperm.xlu0 %2145, %v2053_v9   ;;  %598 = vrot.lane.b32.xlu1 %v2360_v4, %s2268_s24 }
  0x2d   : > { %600 = vrot.lane.b32.xlu0 %v2364_v5, %s2268_s24  ;;  %631 = vperm.xlu1 %2146, %v2054_v10   ;;  %v441_v10 = vlaneseq }
  0x2f   : > { %v2554_v13 = vand.u32 127, %v441_v10 }
  0x31   : > { %618 = vrot.lane.b32.xlu0 %v2360_v4, %s2269_s18  ;;  %620 = vrot.lane.b32.xlu1 %v2364_v5, %s2269_s18  ;;  %v443_v16 = vadd.s32 128, %v2554_v13  ;;  %v448_v19 = vand.u32 15, %v2554_v13  ;;  %vm480_vm2 = vcmp.ge.s32.totalorder %v2554_v13, 16  ;;  %vm523_vm4 = vcmp.lt.s32.totalorder %v2554_v13, 17 }
  0x32   : > { %v2566_v26 = vsel %vm480_vm2, 1.0, %v2272_v24  ;;  %vm542_vm6 = vcmp.lt.s32.totalorder %v2554_v13, 16  ;;  %vm562_vm7 = vcmp.lt.s32.totalorder %v2554_v13, 15  ;;  %vm582_vm10 = vcmp.lt.s32.totalorder %v2554_v13, 1 }
  0x33   : > { %v455_v20 = vand.u32 15, %v443_v16  ;;  %vm468_vm1 = vcmp.gt.s32.totalorder %v448_v19, 0  ;;  %vm474_vm5 = vcmp.lt.s32.totalorder %v448_v19, 15  ;;  %vm487_vm9 = vcmp.lt.s32.totalorder %v443_v16, 240 }
  0x34   : > { %vm602_vm11 = vcmp.lt.s32.totalorder %v2554_v13, 127  ;;  %vm622_vm12 = vcmp.lt.s32.totalorder %v2554_v13, 113  ;;  %vm642_vm13 = vcmp.lt.s32.totalorder %v2554_v13, 112  ;;  %vm662_vm14 = vcmp.lt.s32.totalorder %v2554_v13, 111 }
  0x35   : > { %651 = vperm.xlu0 %2145, %v2055_v22   ;;  %638 = vrot.lane.b32.xlu1 %v2360_v4, %s2270_s22  ;;  %vm469_vm3 = vcmp.gt.s32.totalorder %v455_v20, 0  ;;  %vm475_vm8 = vcmp.lt.s32.totalorder %v455_v20, 15 }
  0x39   : > { %640 = vrot.lane.b32.xlu0 %v2364_v5, %s2270_s22  ;;  %671 = vperm.xlu1 %2146, %v2056_v25   ;;  %v2564_v25 = vsel %vm468_vm1, 1.0, %v2272_v24  ;;  %vm780_vm1 = vcmask 64512  }
  0x3d   : > { %658 = vrot.lane.b32.xlu0 %v2360_v4, %s3427_s27  ;;  %660 = vrot.lane.b32.xlu1 %v2364_v5, %s3427_s27 }
  0x41   : > { %863 = vperm.xlu0 %2145, %v849_v27   ;;  %868 = vperm.xlu1 %2146, %v850_v28   ;;  %v2568_v28 = vsel %vm469_vm3, 1.0, %v2272_v24 }
  0x45   : > { %853 = vperm.xlu0 %2145, %v847_v29   ;;  %858 = vperm.xlu1 %2146, %v848_v30   ;;  %v2574_v30 = vmul.f32 %v2566_v26, %v2564_v25 }
  0x49   : > { %896 = vperm.xlu0 %2145, %v2068_v31   ;;  %901 = vperm.xlu1 %2146, %v2069_v32  }
  0x4d   : > { %960 = vperm.xlu0 %2145, %v946_v33   ;;  %965 = vperm.xlu1 %2146, %v947_v34   ;;  %v2580_v34 = vsel %vm474_vm5, 1.0, %v2272_v24 }
  0x51   : > { %1033 = vperm.xlu0 %2145, %v2072_v35   ;;  %1038 = vperm.xlu1 %2146, %v2073_v36  }
  0x55   : > { %886 = vperm.xlu0 %2145, %v2066_v37   ;;  %891 = vperm.xlu1 %2146, %v2067_v38  }
  0x59   : > { %950 = vperm.xlu0 %2145, %v944_v39   ;;  %955 = vperm.xlu1 %2146, %v945_v40   ;;  %v2589_v39 = vmul.f32 %v2566_v26, %v2580_v34 }
  0x5d   : > { %1106 = vperm.xlu0 %2145, %v2076_v41   ;;  %1111 = vperm.xlu1 %2146, %v2077_v42  }
  0x61   : > { %1023 = vperm.xlu0 %2145, %v2070_v43   ;;  %1028 = vperm.xlu1 %2146, %v2071_v44  }
  0x65   : > { %1179 = vperm.xlu0 %2145, %v2080_v45   ;;  %1184 = vperm.xlu1 %2146, %v2081_v46   ;;  %v2596_v45 = vsel %vm475_vm8, 1.0, %v2272_v24 }
  0x69   : > { %1096 = vperm.xlu0 %2145, %v2074_v47   ;;  %1101 = vperm.xlu1 %2146, %v2075_v48  }
  0x6d   : > { %1252 = vperm.xlu0 %2145, %v2084_v49   ;;  %1257 = vperm.xlu1 %2146, %v2085_v50  }
  0x71   : > { %1169 = vperm.xlu0 %2145, %v2078_v51   ;;  %1174 = vperm.xlu1 %2146, %v2079_v52  }
  0x75   : > { %1325 = vperm.xlu0 %2145, %v2088_v53   ;;  %1330 = vperm.xlu1 %2146, %v2089_v54  }
  0x79   : > { %1242 = vperm.xlu0 %2145, %v2082_v55   ;;  %1247 = vperm.xlu1 %2146, %v2083_v56  }
  0x7d   : > { %1398 = vperm.xlu0 %2145, %v2092_v57   ;;  %1403 = vperm.xlu1 %2146, %v2093_v58  }
  0x81   : > { %1315 = vperm.xlu0 %2145, %v2086_v59   ;;  %1320 = vperm.xlu1 %2146, %v2087_v60  }
  0x85   : > { %1471 = vperm.xlu0 %2145, %v2096_v61   ;;  %1476 = vperm.xlu1 %2146, %v2097_v62  }
  0x88   : > { %v532_v1 = vpop.permute.xlu1 %531  ;;  %v508_v3 = vpop.permute.xlu0 %507 }
  0x89   : > { %1388 = vperm.xlu0 %2145, %v2090_v63   ;;  %1393 = vperm.xlu1 %2146, %v2091_v0   ;;  %v511_v36 = vmul.f32 %v508_v3, %v2364_v5  ;;  %v510_v41 = vmul.f32 %v508_v3, %v2360_v4  ;;  %v2603_v4 = vsel %vm487_vm9, 1.0, %v2272_v24 }
  0x8a   : > { %3469 = vst [vmem:[#allocation2_spill] sm:$0xff] %v2603_v4  ;;  %v2620_v0 = vmul.f32 %v2603_v4, %v2568_v28 }
  0x8c   : > { %v515_v8 = vpop.permute.xlu0 %514  ;;  %v520_v9 = vpop.permute.xlu1 %519  ;;  %3470 = vst [vmem:[#allocation3_spill] sm:$0xff] %v2620_v0 }
  0x8d   : > { %1461 = vperm.xlu0 %2145, %v2094_v6   ;;  %1466 = vperm.xlu1 %2146, %v2095_v7   ;;  %v518_v47 = vadd.f32 %v515_v8, %v511_v36  ;;  %v517_v54 = vadd.f32 %v515_v8, %v510_v41 }
  0x90   : > { %v522_v11 = vpop.permute.xlu0 %521  ;;  %v552_v12 = vpop.permute.xlu1 %551 }
  0x91   : > { %v524_v29 = vsel %vm523_vm4, %v520_v9, %v522_v11  ;;  %v525_v32 = vsel %vm523_vm4, %v522_v11, %v520_v9 }
  0x92   : > { %v527_v33 = vmul.f32 %v2568_v28, %v524_v29  ;;  %v526_v38 = vmul.f32 %v525_v32, %v2574_v30 }
  0x94   : > { %v539_v14 = vpop.permute.xlu0 %538  ;;  %v541_v15 = vpop.permute.xlu1 %540  ;;  %v535_v42 = vmul.f32 %v532_v1, %v527_v33  ;;  %v534_v49 = vmul.f32 %v532_v1, %v526_v38 }
  0x95   : > { %v544_v37 = vsel %vm542_vm6, %v541_v15, %v539_v14  ;;  %v543_v48 = vsel %vm542_vm6, %v539_v14, %v541_v15 }
  0x96   : > { %v545_v44 = vmul.f32 %v2566_v26, %v544_v37  ;;  %v537_v55 = vadd.f32 %v535_v42, %v518_v47  ;;  %v555_v59 = vmul.f32 %v552_v12, %v543_v48  ;;  %v536_v1 = vadd.f32 %v534_v49, %v517_v54 }
  0x98   : > { %v2557_v17 = vpop.permute.xlu0 %571  ;;  %v559_v18 = vpop.permute.xlu1 %558  ;;  %v554_v58 = vmul.f32 %v552_v12, %v545_v44  ;;  %v557_v15 = vadd.f32 %v555_v59, %v537_v55 }
  0x9a   : > { %v556_v14 = vadd.f32 %v554_v58, %v536_v1 }
  0x9c   : > { %v561_v21 = vpop.permute.xlu0 %560  ;;  %v2560_v22 = vpop.permute.xlu1 %591 }
  0x9d   : > { %v564_v43 = vsel %vm562_vm7, %v561_v21, %v559_v18  ;;  %v563_v46 = vsel %vm562_vm7, %v559_v18, %v561_v21 }
  0x9e   : > { %v565_v50 = vmul.f32 %v564_v43, %v2589_v39  ;;  %v566_v56 = vmul.f32 %v2596_v45, %v563_v46 }
  0xa0   : > { %v579_v23 = vpop.permute.xlu0 %578  ;;  %v581_v27 = vpop.permute.xlu1 %580  ;;  %v574_v3 = vmul.f32 %v2557_v17, %v565_v50  ;;  %v575_v9 = vmul.f32 %v2557_v17, %v566_v56 }
  0xa1   : > { %v583_v51 = vsel %vm582_vm10, %v579_v23, %v581_v27  ;;  %v584_v52 = vsel %vm582_vm10, %v581_v27, %v579_v23 }
  0xa2   : > { %v585_v62 = vmul.f32 %v2564_v25, %v584_v52  ;;  %v586_v63 = vmul.f32 %v2568_v28, %v583_v51  ;;  %v576_v21 = vadd.f32 %v574_v3, %v556_v14  ;;  %v577_v17 = vadd.f32 %v575_v9, %v557_v15 }
  0xa4   : > { %v612_v31 = vpop.permute.xlu0 %611  ;;  %v599_v35 = vpop.permute.xlu1 %598  ;;  %v594_v16 = vmul.f32 %v2560_v22, %v585_v62  ;;  %v595_v18 = vmul.f32 %v2560_v22, %v586_v63  ;;  %v2642_v22 = vmul.f32 %v2603_v4, %v2596_v45  ;;  %v2150_v62 = vld [vmem:[%s3420_s5 + $0x8] sm:$0xff]  }
  0xa6   : > { %3471 = vst [vmem:[#allocation4_spill] sm:$0xff] %v2642_v22  ;;  %v596_v36 = vadd.f32 %v594_v16, %v576_v21  ;;  %v597_v37 = vadd.f32 %v595_v18, %v577_v17 }
  0xa8   : > { %v601_v40 = vpop.permute.xlu0 %600  ;;  %v632_v5 = vpop.permute.xlu1 %631 }
  0xa9   : > { %v603_v60 = vsel %vm602_vm11, %v599_v35, %v601_v40  ;;  %v604_v61 = vsel %vm602_vm11, %v601_v40, %v599_v35 }
  0xaa   : > { %v605_v10 = vmul.f32 %v2580_v34, %v603_v60  ;;  %v606_v11 = vmul.f32 %v2596_v45, %v604_v61  ;;  %v2149_v61 = vld [vmem:[%s3420_s5] sm:$0xff]  }
  0xac   : > { %v619_v53 = vpop.permute.xlu0 %618  ;;  %v621_v57 = vpop.permute.xlu1 %620  ;;  %v614_v24 = vmul.f32 %v612_v31, %v605_v10  ;;  %v615_v27 = vmul.f32 %v612_v31, %v606_v11 }
  0xad   : > { %v623_v6 = vsel %vm622_vm12, %v619_v53, %v621_v57  ;;  %v624_v7 = vsel %vm622_vm12, %v621_v57, %v619_v53 }
  0xae   : > { %v625_v19 = vmul.f32 %v2564_v25, %v623_v6  ;;  %v626_v20 = vmul.f32 %v624_v7, %v2620_v0  ;;  %v616_v41 = vadd.f32 %v614_v24, %v596_v36  ;;  %v617_v42 = vadd.f32 %v615_v27, %v597_v37 }
  0xb0   : > { %v652_v8 = vpop.permute.xlu0 %651  ;;  %v639_v12 = vpop.permute.xlu1 %638  ;;  %v634_v38 = vmul.f32 %v632_v5, %v625_v19  ;;  %v635_v40 = vmul.f32 %v632_v5, %v626_v20 }
  0xb2   : > { %v637_v49 = vadd.f32 %v635_v40, %v617_v42  ;;  %v636_v50 = vadd.f32 %v634_v38, %v616_v41 }
  0xb4   : > { %v641_v23 = vpop.permute.xlu0 %640  ;;  %v672_v32 = vpop.permute.xlu1 %671 }
  0xb5   : > { %v644_v29 = vsel %vm642_vm13, %v641_v23, %v639_v12  ;;  %v643_v33 = vsel %vm642_vm13, %v639_v12, %v641_v23 }
  0xb6   : > { %v646_v35 = vmul.f32 %v2603_v4, %v644_v29  ;;  %v654_v43 = vmul.f32 %v652_v8, %v643_v33 }
  0xb8   : > { %v659_v31 = vpop.permute.xlu0 %658  ;;  %v655_v44 = vmul.f32 %v652_v8, %v646_v35  ;;  %v661_v46 = vpop.permute.xlu1 %660  ;;  %v656_v53 = vadd.f32 %v654_v43, %v636_v50 }
  0xb9   : > { %v663_v47 = vsel %vm662_vm14, %v659_v31, %v661_v46  ;;  %v664_v48 = vsel %vm662_vm14, %v661_v46, %v659_v31 }
  0xba   : > { %v665_v51 = vmul.f32 %v2580_v34, %v663_v47  ;;  %v666_v52 = vmul.f32 %v664_v48, %v2642_v22  ;;  %v657_v5 = vadd.f32 %v655_v44, %v637_v49 }
  0xbc   : > { %v674_v54 = vmul.f32 %v672_v32, %v665_v51  ;;  %v675_v55 = vmul.f32 %v672_v32, %v666_v52  ;;  %v2667_v14 = vpop.permute.xlu0 %863  ;;  %v2674_v21 = vpop.permute.xlu1 %868 }
  0xbe   : > { %v677_v56 = vadd.f32 %v675_v55, %v657_v5  ;;  %v676_v57 = vadd.f32 %v674_v54, %v656_v53 }
  0xc0   : > { %v683_v58 = vpack.c.bf16 %v677_v56, %v677_v56  ;;  %v682_v59 = vpack.c.bf16 %v676_v57, %v676_v57  ;;  %v2678_v17 = vpop.permute.xlu0 %853  ;;  %v2687_v32 = vpop.permute.xlu1 %858 }
  0xc2   : > { %2063 = vmatprep.subr.msk.bf16.mxu0 %vm787_vm15, %v683_v58  ;;  %2121 = vmatprep.subr.msk.bf16.mxu1 %vm787_vm15, %v683_v58  ;;  %v789_v60 = vsel %vm787_vm15, %v682_v59, 0 }
  0xc3   : > { %809 = vmatpush1.bf16.msra.mxu0 %v789_v60  ;;  %2122 = vmatpush1.bf16.msra.mxu1 %v789_v60 }
  0xc4   : > { %v2692_v36 = vpop.permute.xlu0 %896  ;;  %v2701_v38 = vpop.permute.xlu1 %901 }
  0xc6   : > { %2064 = vmatmul.mubr.msk.bf16.vlgmr.msra.gmra.mxu0 %vm780_vm1, %v2149_v61  ;;  %2065 = vmatmul.mubr.msk.bf16.vlgmr.msra.gmra.mxu1 %vm780_vm1, %v2150_v62 }
  0xc7   : > { %1627 = vmatprep.mubr.bf16.mxu0 %v3429_v2  ;;  %1657 = vmatprep.mubr.bf16.mxu1 %v3429_v2 }
  0xc8   : > { %v2707_v40 = vpop.permute.xlu0 %960  ;;  %v2713_v31 = vpop.permute.xlu1 %965 }
  0xcc   : > { %v2715_v41 = vpop.permute.xlu0 %1033  ;;  %v2721_v42 = vpop.permute.xlu1 %1038 }
  0xd0   : > { %v2727_v43 = vpop.permute.xlu0 %886  ;;  %v2733_v44 = vpop.permute.xlu1 %891 }
  0xd4   : > { %v2735_v46 = vpop.permute.xlu0 %950  ;;  %v2741_v47 = vpop.permute.xlu1 %955 }
  0xd8   : > { %v2747_v48 = vpop.permute.xlu0 %1106  ;;  %v2753_v49 = vpop.permute.xlu1 %1111 }
  0xdc   : > { %v2755_v50 = vpop.permute.xlu0 %1023  ;;  %v2761_v51 = vpop.permute.xlu1 %1028 }
  0xde   : > { %v751_v63 = vpop.f32.mrf.mxu0 }
  0xe0   : > { %v2659_v1 = vpop.f32.mrf.mxu0  ;;  %v2767_v52 = vpop.permute.xlu0 %1179 }
  0xe1   : > { %v2773_v53 = vpop.permute.xlu1 %1184 }
  0xe2   : > { %v755_v3 = vpop.f32.mrf.mxu0 }
  0xe4   : > { %v2661_v6 = vpop.f32.mrf.mxu0  ;;  %v2775_v5 = vpop.permute.xlu0 %1096 }
  0xe5   : > { %v2782_v56 = vpop.permute.xlu1 %1101 }
  0xe6   : > { %v761_v7 = vpop.f32.mrf.mxu0 }
  0xe8   : > { %v2663_v8 = vpop.f32.mrf.mxu0  ;;  %v2788_v57 = vpop.permute.xlu0 %1252 }
  0xe9   : > { %v2798_v60 = vpop.permute.xlu1 %1257 }
  0xea   : > { %v765_v9 = vpop.f32.mrf.mxu0  ;;  %3473 = vst [vmem:[#allocation5_spill] sm:$0xff] %v2798_v60 }
  0xec   : > { %v2665_v10 = vpop.f32.mrf.mxu0 }
 0x186   : > { %v828_v11 = vpop.f32.mrf.mxu0  ;;  %v838_v12 = vpop.f32.mrf.mxu1 }
 0x187   : > { %v839_v15 = vadd.f32 %v838_v12, %v761_v7  ;;  %v829_v24 = vadd.f32 %v828_v11, %v751_v63 }
 0x188   : > { %v840_v16 = vpop.f32.mrf.mxu1  ;;  %v2672_v19 = vpop.f32.mrf.mxu0 }
 0x189   : > { %v2670_v18 = vadd.f32 %v2667_v14, %v839_v15  ;;  %v2690_v33 = vadd.f32 %v2678_v17, %v829_v24  ;;  %v841_v54 = vadd.f32 %v840_v16, %v2663_v8  ;;  %v831_v61 = vadd.f32 %v2672_v19, %v2659_v1 }
 0x18a   : > { %v842_v20 = vpop.f32.mrf.mxu1  ;;  %v832_v29 = vpop.f32.mrf.mxu0 }
 0x18b   : > { %v843_v23 = vadd.f32 %v842_v20, %v765_v9  ;;  %916 = vrot.lane.b32.xlu0 %v2670_v18, %s2264_s29  ;;  %v833_v35 = vadd.f32 %v832_v29, %v755_v3  ;;  %v2791_v58 = vadd.f32 %v2667_v14, %v841_v54  ;;  %v2805_v3 = vpop.permute.xlu0 %1169  ;;  %v2812_v7 = vadd.f32 %v2678_v17, %v831_v61  ;;  %v2815_v9 = vpop.permute.xlu1 %1174 }
 0x18c   : > { %v844_v55 = vpop.f32.mrf.mxu1  ;;  %v834_v63 = vpop.f32.mrf.mxu0  ;;  %3474 = vst [vmem:[#allocation6_spill] sm:$0xff] %v2805_v3  ;;  %3475 = vst [vmem:[#allocation7_spill] sm:$0xff] %v2815_v9 }
 0x18d   : > { %v2681_v27 = vadd.f32 %v2674_v21, %v843_v23  ;;  %v2699_v37 = vadd.f32 %v2687_v32, %v833_v35  ;;  %v845_v59 = vadd.f32 %v844_v55, %v2665_v10  ;;  %v835_v8 = vadd.f32 %v834_v63, %v2661_v6 }
 0x18f   : > { %918 = vrot.lane.b32.xlu1 %v2681_v27, %s2264_s29  ;;  %988 = vrot.lane.b32.xlu0 %v2670_v18, %s2265_s13  ;;  %v2803_v62 = vadd.f32 %v2674_v21, %v845_v59  ;;  %v2821_v1 = vpop.permute.xlu0 %1325  ;;  %v2824_v10 = vadd.f32 %v2687_v32, %v835_v8  ;;  %v2830_v6 = vpop.permute.xlu1 %1330 }
 0x190   : > { %3476 = vst [vmem:[#allocation8_spill] sm:$0xff] %v2821_v1  ;;  %3477 = vst [vmem:[#allocation9_spill] sm:$0xff] %v2830_v6 }
 0x193   : > { %990 = vrot.lane.b32.xlu1 %v2681_v27, %s2265_s13  ;;  %912 = vrot.lane.b32.xlu0 %v2690_v33, %s2264_s29  ;;  %v2832_v11 = vpop.permute.xlu0 %1242  ;;  %v2838_v12 = vpop.permute.xlu1 %1247 }
 0x194   : > { %3478 = vst [vmem:[#allocation10_spill] sm:$0xff] %v2832_v11  ;;  %3479 = vst [vmem:[#allocation11_spill] sm:$0xff] %v2838_v12 }
 0x197   : > { %914 = vrot.lane.b32.xlu1 %v2699_v37, %s2264_s29  ;;  %1061 = vrot.lane.b32.xlu0 %v2670_v18, %s2266_s20  ;;  %v2844_v14 = vpop.permute.xlu0 %1398  ;;  %v2850_v15 = vpop.permute.xlu1 %1403 }
 0x198   : > { %3480 = vst [vmem:[#allocation12_spill] sm:$0xff] %v2844_v14  ;;  %3481 = vst [vmem:[#allocation13_spill] sm:$0xff] %v2850_v15 }
 0x19b   : > { %1063 = vrot.lane.b32.xlu1 %v2681_v27, %s2266_s20  ;;  %1134 = vrot.lane.b32.xlu0 %v2670_v18, %s2267_s21  ;;  %v2852_v16 = vpop.permute.xlu0 %1315  ;;  %v2858_v19 = vpop.permute.xlu1 %1320 }
 0x19c   : > { %3482 = vst [vmem:[#allocation14_spill] sm:$0xff] %v2852_v16  ;;  %3483 = vst [vmem:[#allocation15_spill] sm:$0xff] %v2858_v19 }
 0x19f   : > { %1136 = vrot.lane.b32.xlu1 %v2681_v27, %s2267_s21  ;;  %984 = vrot.lane.b32.xlu0 %v2690_v33, %s2265_s13  ;;  %v2864_v20 = vpop.permute.xlu0 %1471  ;;  %v2870_v21 = vpop.permute.xlu1 %1476 }
 0x1a0   : > { %3484 = vst [vmem:[#allocation16_spill] sm:$0xff] %v2864_v20  ;;  %3485 = vst [vmem:[#allocation17_spill] sm:$0xff] %v2870_v21 }
 0x1a3   : > { %986 = vrot.lane.b32.xlu1 %v2699_v37, %s2265_s13  ;;  %1057 = vrot.lane.b32.xlu0 %v2690_v33, %s2266_s20  ;;  %v2872_v23 = vpop.permute.xlu0 %1388  ;;  %v2878_v17 = vpop.permute.xlu1 %1393 }
 0x1a4   : > { %3486 = vst [vmem:[#allocation18_spill] sm:$0xff] %v2872_v23  ;;  %3487 = vst [vmem:[#allocation19_spill] sm:$0xff] %v2878_v17 }
 0x1a7   : > { %1059 = vrot.lane.b32.xlu1 %v2699_v37, %s2266_s20  ;;  %1207 = vrot.lane.b32.xlu0 %v2670_v18, %s2268_s24  ;;  %v2884_v24 = vpop.permute.xlu0 %1461  ;;  %v2890_v29 = vpop.permute.xlu1 %1466 }
 0x1a8   : > { %3488 = vst [vmem:[#allocation20_spill] sm:$0xff] %v2884_v24  ;;  %3489 = vst [vmem:[#allocation21_spill] sm:$0xff] %v2890_v29 }
 0x1ab   : > { %1209 = vrot.lane.b32.xlu1 %v2681_v27, %s2268_s24  ;;  %1130 = vrot.lane.b32.xlu0 %v2690_v33, %s2267_s21 }
 0x1af   : > { %1132 = vrot.lane.b32.xlu1 %v2699_v37, %s2267_s21  ;;  %1280 = vrot.lane.b32.xlu0 %v2670_v18, %s2269_s18 }
 0x1b3   : > { %1282 = vrot.lane.b32.xlu1 %v2681_v27, %s2269_s18  ;;  %1203 = vrot.lane.b32.xlu0 %v2690_v33, %s2268_s24 }
 0x1b7   : > { %1205 = vrot.lane.b32.xlu1 %v2699_v37, %s2268_s24  ;;  %1353 = vrot.lane.b32.xlu0 %v2670_v18, %s2270_s22 }
 0x1bb   : > { %1355 = vrot.lane.b32.xlu1 %v2681_v27, %s2270_s22  ;;  %1276 = vrot.lane.b32.xlu0 %v2690_v33, %s2269_s18 }
 0x1bf   : > { %1278 = vrot.lane.b32.xlu1 %v2699_v37, %s2269_s18  ;;  %1426 = vrot.lane.b32.xlu0 %v2670_v18, %s3472_s19 }
 0x1c3   : > { %1428 = vrot.lane.b32.xlu1 %v2681_v27, %s3472_s19  ;;  %1349 = vrot.lane.b32.xlu0 %v2690_v33, %s2270_s22 }
 0x1c7   : > { %1351 = vrot.lane.b32.xlu1 %v2699_v37, %s2270_s22  ;;  %1422 = vrot.lane.b32.xlu0 %v2690_v33, %s3472_s19 }
 0x1cb   : > { %1424 = vrot.lane.b32.xlu1 %v2699_v37, %s3472_s19  ;;  %924 = vrot.lane.b32.xlu0 %v2791_v58, %s2264_s29 }
 0x1cf   : > { %926 = vrot.lane.b32.xlu1 %v2803_v62, %s2264_s29  ;;  %996 = vrot.lane.b32.xlu0 %v2791_v58, %s2265_s13 }
 0x1d3   : > { %998 = vrot.lane.b32.xlu1 %v2803_v62, %s2265_s13  ;;  %920 = vrot.lane.b32.xlu0 %v2812_v7, %s2264_s29 }
 0x1d7   : > { %922 = vrot.lane.b32.xlu1 %v2824_v10, %s2264_s29  ;;  %1069 = vrot.lane.b32.xlu0 %v2791_v58, %s2266_s20 }
 0x1db   : > { %1071 = vrot.lane.b32.xlu1 %v2803_v62, %s2266_s20  ;;  %1142 = vrot.lane.b32.xlu0 %v2791_v58, %s2267_s21 }
 0x1df   : > { %1144 = vrot.lane.b32.xlu1 %v2803_v62, %s2267_s21  ;;  %992 = vrot.lane.b32.xlu0 %v2812_v7, %s2265_s13 }
 0x1e3   : > { %994 = vrot.lane.b32.xlu1 %v2824_v10, %s2265_s13  ;;  %1065 = vrot.lane.b32.xlu0 %v2812_v7, %s2266_s20  ;;  %s3349_s13 = scalar_lea.vmem %s3417_s2, %s2395_s25 }
 0x1e7   : > { %1067 = vrot.lane.b32.xlu1 %v2824_v10, %s2266_s20  ;;  %1215 = vrot.lane.b32.xlu0 %v2791_v58, %s2268_s24 }
 0x1eb   : > { %1217 = vrot.lane.b32.xlu1 %v2803_v62, %s2268_s24  ;;  %1138 = vrot.lane.b32.xlu0 %v2812_v7, %s2267_s21 }
 0x1ef   : > { %1140 = vrot.lane.b32.xlu1 %v2824_v10, %s2267_s21  ;;  %1288 = vrot.lane.b32.xlu0 %v2791_v58, %s2269_s18 }
 0x1f3   : > { %1290 = vrot.lane.b32.xlu1 %v2803_v62, %s2269_s18  ;;  %1211 = vrot.lane.b32.xlu0 %v2812_v7, %s2268_s24 }
 0x1f7   : > { %1213 = vrot.lane.b32.xlu1 %v2824_v10, %s2268_s24  ;;  %1361 = vrot.lane.b32.xlu0 %v2791_v58, %s2270_s22  ;;  %s3361_s24 = scalar_lea.vmem %s3426_s11, %s2395_s25 }
 0x1fb   : > { %1363 = vrot.lane.b32.xlu1 %v2803_v62, %s2270_s22  ;;  %1284 = vrot.lane.b32.xlu0 %v2812_v7, %s2269_s18 }
 0x1fd   : > { %v917_v32 = vpop.permute.xlu0 %916 }
 0x1ff   : > { %1286 = vrot.lane.b32.xlu1 %v2824_v10, %s2269_s18  ;;  %1434 = vrot.lane.b32.xlu0 %v2791_v58, %s3472_s19 }
 0x201   : > { %v919_v35 = vpop.permute.xlu1 %918  ;;  %v989_v54 = vpop.permute.xlu0 %988 }
 0x203   : > { %1436 = vrot.lane.b32.xlu1 %v2803_v62, %s3472_s19  ;;  %1357 = vrot.lane.b32.xlu0 %v2812_v7, %s2270_s22 }
 0x205   : > { %v2900_v55 = vpop.permute.xlu1 %990  ;;  %v2902_v59 = vpop.permute.xlu0 %912 }
 0x207   : > { %1359 = vrot.lane.b32.xlu1 %v2824_v10, %s2270_s22  ;;  %1430 = vrot.lane.b32.xlu0 %v2812_v7, %s3472_s19 }
 0x209   : > { %v2908_v61 = vpop.permute.xlu1 %914  ;;  %v2910_v63 = vpop.permute.xlu0 %1061 }
 0x20b   : > { %1432 = vrot.lane.b32.xlu1 %v2824_v10, %s3472_s19 }
 0x20d   : > { %v2914_v8 = vpop.permute.xlu1 %1063  ;;  %v2916_v2 = vpop.permute.xlu0 %1134 }
 0x211   : > { %v2918_v29 = vpop.permute.xlu1 %1136  ;;  %v2920_v24 = vpop.permute.xlu0 %984 }
 0x215   : > { %v2922_v17 = vpop.permute.xlu1 %986  ;;  %v2924_v21 = vpop.permute.xlu0 %1057 }
 0x219   : > { %v2926_v23 = vpop.permute.xlu1 %1059  ;;  %v2928_v20 = vpop.permute.xlu0 %1207 }
 0x21d   : > { %v2930_v22 = vpop.permute.xlu1 %1209  ;;  %v2932_v19 = vpop.permute.xlu0 %1130 }
 0x221   : > { %v2934_v16 = vpop.permute.xlu1 %1132  ;;  %v2936_v15 = vpop.permute.xlu0 %1280 }
 0x222   : > { %3490 = vst [vmem:[#allocation22_spill] sm:$0xff] %v2934_v16  ;;  %3491 = vst [vmem:[#allocation23_spill] sm:$0xff] %v2936_v15 }
 0x225   : > { %v2938_v4 = vpop.permute.xlu1 %1282  ;;  %v2940_v12 = vpop.permute.xlu0 %1203 }
 0x226   : > { %3492 = vst [vmem:[#allocation24_spill] sm:$0xff] %v2938_v4  ;;  %3493 = vst [vmem:[#allocation25_spill] sm:$0xff] %v2940_v12 }
 0x229   : > { %v2942_v14 = vpop.permute.xlu1 %1205  ;;  %v2944_v11 = vpop.permute.xlu0 %1353 }
 0x22a   : > { %3494 = vst [vmem:[#allocation26_spill] sm:$0xff] %v2942_v14  ;;  %3495 = vst [vmem:[#allocation27_spill] sm:$0xff] %v2944_v11 }
 0x22d   : > { %v2946_v6 = vpop.permute.xlu1 %1355  ;;  %v2948_v1 = vpop.permute.xlu0 %1276 }
 0x22e   : > { %3496 = vst [vmem:[#allocation28_spill] sm:$0xff] %v2946_v6  ;;  %3497 = vst [vmem:[#allocation29_spill] sm:$0xff] %v2948_v1 }
 0x231   : > { %v2950_v0 = vpop.permute.xlu1 %1278  ;;  %v2952_v9 = vpop.permute.xlu0 %1426 }
 0x232   : > { %3498 = vst [vmem:[#allocation30_spill] sm:$0xff] %v2950_v0  ;;  %3499 = vst [vmem:[#allocation31_spill] sm:$0xff] %v2952_v9 }
 0x235   : > { %v2954_v3 = vpop.permute.xlu1 %1428  ;;  %v2956_v16 = vpop.permute.xlu0 %1349 }
 0x236   : > { %3500 = vst [vmem:[#allocation32_spill] sm:$0xff] %v2954_v3  ;;  %3501 = vst [vmem:[#allocation33_spill] sm:$0xff] %v2956_v16  ;;  %v908_v16 = vmul.f32 %v2692_v36, %v2670_v18 }
 0x239   : > { %v2958_v15 = vpop.permute.xlu1 %1351  ;;  %v2960_v4 = vpop.permute.xlu0 %1422 }
 0x23a   : > { %3502 = vst [vmem:[#allocation34_spill] sm:$0xff] %v2958_v15  ;;  %3503 = vst [vmem:[#allocation35_spill] sm:$0xff] %v2960_v4 }
 0x23d   : > { %v2962_v12 = vpop.permute.xlu1 %1424  ;;  %v925_v14 = vpop.permute.xlu0 %924 }
 0x23e   : > { %3504 = vst [vmem:[#allocation36_spill] sm:$0xff] %v2962_v12  ;;  %v930_v6 = vsel %vm523_vm4, %v917_v32, %v925_v14  ;;  %v934_v1 = vsel %vm523_vm4, %v925_v14, %v917_v32  ;;  %v909_v12 = vmul.f32 %v2692_v36, %v2791_v58  ;;  %v904_v32 = vmul.f32 %v2727_v43, %v2690_v33 }
 0x23f   : > { %v940_v0 = vmul.f32 %v934_v1, %v2574_v30  ;;  %v941_v9 = vmul.f32 %v2568_v28, %v930_v6 }
 0x241   : > { %v972_v15 = vmul.f32 %v2707_v40, %v940_v0  ;;  %v973_v4 = vmul.f32 %v2707_v40, %v941_v9  ;;  %v927_v3 = vpop.permute.xlu1 %926  ;;  %v997_v11 = vpop.permute.xlu0 %996 }
 0x242   : > { %v931_v60 = vsel %vm523_vm4, %v919_v35, %v927_v3  ;;  %v935_v1 = vsel %vm523_vm4, %v927_v3, %v919_v35  ;;  %v1002_v6 = vsel %vm542_vm6, %v989_v54, %v997_v11  ;;  %v1006_v18 = vsel %vm542_vm6, %v997_v11, %v989_v54 }
 0x243   : > { %v980_v0 = vadd.f32 %v972_v15, %v908_v16  ;;  %v942_v40 = vmul.f32 %v935_v1, %v2574_v30  ;;  %v943_v9 = vmul.f32 %v2568_v28, %v931_v60  ;;  %v981_v14 = vadd.f32 %v973_v4, %v909_v12 }
 0x244   : > { %v1012_v36 = vmul.f32 %v2566_v26, %v1006_v18  ;;  %v1046_v58 = vmul.f32 %v2715_v41, %v1002_v6  ;;  %v910_v3 = vmul.f32 %v2701_v38, %v2681_v27  ;;  %v911_v15 = vmul.f32 %v2701_v38, %v2803_v62 }
 0x245   : > { %v974_v35 = vmul.f32 %v2713_v31, %v942_v40  ;;  %v975_v11 = vmul.f32 %v2713_v31, %v943_v9  ;;  %v999_v16 = vpop.permute.xlu1 %998  ;;  %v921_v60 = vpop.permute.xlu0 %920  ;;  %v905_v18 = vmul.f32 %v2727_v43, %v2812_v7 }
 0x246   : > { %v1045_v4 = vmul.f32 %v2715_v41, %v1012_v36  ;;  %v1054_v12 = vadd.f32 %v1046_v58, %v981_v14  ;;  %v1003_v54 = vsel %vm542_vm6, %v2900_v55, %v999_v16  ;;  %v1007_v27 = vsel %vm542_vm6, %v999_v16, %v2900_v55 }
 0x247   : > { %v982_v33 = vadd.f32 %v974_v35, %v910_v3  ;;  %v983_v1 = vadd.f32 %v975_v11, %v911_v15  ;;  %v1014_v31 = vmul.f32 %v2566_v26, %v1007_v27  ;;  %v1048_v6 = vmul.f32 %v2721_v42, %v1003_v54 }
 0x248   : > { %v1053_v38 = vadd.f32 %v1045_v4, %v980_v0  ;;  %v928_v41 = vsel %vm523_vm4, %v2902_v59, %v921_v60  ;;  %v932_v62 = vsel %vm523_vm4, %v921_v60, %v2902_v59  ;;  %v906_v15 = vmul.f32 %v2733_v44, %v2699_v37 }
 0x249   : > { %v1047_v55 = vmul.f32 %v2721_v42, %v1014_v31  ;;  %v1056_v40 = vadd.f32 %v1048_v6, %v983_v1  ;;  %v936_v9 = vmul.f32 %v932_v62, %v2574_v30  ;;  %v937_v14 = vmul.f32 %v2568_v28, %v928_v41  ;;  %v923_v36 = vpop.permute.xlu1 %922  ;;  %v1070_v0 = vpop.permute.xlu0 %1069 }
 0x24a   : > { %v929_v58 = vsel %vm523_vm4, %v2908_v61, %v923_v36  ;;  %v933_v59 = vsel %vm523_vm4, %v923_v36, %v2908_v61  ;;  %v1075_v43 = vsel %vm562_vm7, %v2910_v63, %v1070_v0  ;;  %v1079_v42 = vsel %vm562_vm7, %v1070_v0, %v2910_v63 }
 0x24b   : > { %v1055_v7 = vadd.f32 %v1047_v55, %v982_v33  ;;  %v968_v3 = vmul.f32 %v2735_v46, %v936_v9  ;;  %v969_v35 = vmul.f32 %v2735_v46, %v937_v14  ;;  %v938_v11 = vmul.f32 %v933_v59, %v2574_v30 }
 0x24c   : > { %v939_v61 = vmul.f32 %v2568_v28, %v929_v58  ;;  %v1085_v16 = vmul.f32 %v1079_v42, %v2589_v39  ;;  %v1086_v60 = vmul.f32 %v2596_v45, %v1075_v43  ;;  %v907_v46 = vmul.f32 %v2733_v44, %v2824_v10 }
 0x24d   : > { %v976_v4 = vadd.f32 %v968_v3, %v904_v32  ;;  %v970_v54 = vmul.f32 %v2741_v47, %v938_v11  ;;  %v1072_v63 = vpop.permute.xlu1 %1071  ;;  %v1143_v27 = vpop.permute.xlu0 %1142  ;;  %v977_v33 = vadd.f32 %v969_v35, %v905_v18 }
 0x24e   : > { %v971_v30 = vmul.f32 %v2741_v47, %v939_v61  ;;  %v1118_v1 = vmul.f32 %v2747_v48, %v1085_v16  ;;  %v1119_v37 = vmul.f32 %v2747_v48, %v1086_v60  ;;  %v1076_v31 = vsel %vm562_vm7, %v2914_v8, %v1072_v63 }
 0x24f   : > { %v978_v6 = vadd.f32 %v970_v54, %v906_v15  ;;  %v1080_v32 = vsel %vm562_vm7, %v1072_v63, %v2914_v8  ;;  %v1088_v41 = vmul.f32 %v2596_v45, %v1076_v31  ;;  %v1148_v44 = vsel %vm582_vm10, %v2916_v2, %v1143_v27 }
 0x250   : > { %v1126_v47 = vadd.f32 %v1118_v1, %v1053_v38  ;;  %v1127_v10 = vadd.f32 %v1119_v37, %v1054_v12  ;;  %v1087_v62 = vmul.f32 %v1080_v32, %v2589_v39  ;;  %v1152_v48 = vsel %vm582_vm10, %v1143_v27, %v2916_v2 }
 0x251   : > { %v1121_v18 = vmul.f32 %v2753_v49, %v1088_v41  ;;  %v1158_v55 = vmul.f32 %v2564_v25, %v1152_v48  ;;  %v1159_v8 = vmul.f32 %v2568_v28, %v1148_v44  ;;  %v1145_v9 = vpop.permute.xlu1 %1144  ;;  %v993_v14 = vpop.permute.xlu0 %992  ;;  %v979_v36 = vadd.f32 %v971_v30, %v907_v46 }
 0x252   : > { %v1120_v0 = vmul.f32 %v2753_v49, %v1087_v62  ;;  %v1149_v12 = vsel %vm582_vm10, %v2918_v29, %v1145_v9  ;;  %v1153_v38 = vsel %vm582_vm10, %v1145_v9, %v2918_v29  ;;  %v1000_v2 = vsel %vm542_vm6, %v2920_v24, %v993_v14 }
 0x253   : > { %v1129_v58 = vadd.f32 %v1121_v18, %v1056_v40  ;;  %v1191_v59 = vmul.f32 %v2767_v52, %v1158_v55  ;;  %v1192_v43 = vmul.f32 %v2767_v52, %v1159_v8  ;;  %v1160_v42 = vmul.f32 %v2564_v25, %v1153_v38 }
 0x254   : > { %v1128_v49 = vadd.f32 %v1120_v0, %v1055_v7  ;;  %v1161_v3 = vmul.f32 %v2568_v28, %v1149_v12  ;;  %v1004_v35 = vsel %vm542_vm6, %v993_v14, %v2920_v24  ;;  %v1042_v29 = vmul.f32 %v2755_v50, %v1000_v2 }
 0x255   : > { %v1199_v11 = vadd.f32 %v1191_v59, %v1126_v47  ;;  %v1200_v15 = vadd.f32 %v1192_v43, %v1127_v10  ;;  %v1193_v61 = vmul.f32 %v2773_v53, %v1160_v42  ;;  %v1008_v40 = vmul.f32 %v2566_v26, %v1004_v35  ;;  %v995_v16 = vpop.permute.xlu1 %994  ;;  %v1066_v60 = vpop.permute.xlu0 %1065 }
 0x256   : > { %v1194_v52 = vmul.f32 %v2773_v53, %v1161_v3  ;;  %v1050_v54 = vadd.f32 %v1042_v29, %v977_v33  ;;  %v1001_v7 = vsel %vm542_vm6, %v2922_v17, %v995_v16  ;;  %v1005_v24 = vsel %vm542_vm6, %v995_v16, %v2922_v17  ;;  %v3505_v3 = vld [vmem:[#allocation5_spill] sm:$0xff] }
 0x257   : > { %v1201_v63 = vadd.f32 %v1193_v61, %v1128_v49  ;;  %v1041_v27 = vmul.f32 %v2755_v50, %v1008_v40  ;;  %v1010_v46 = vmul.f32 %v2566_v26, %v1005_v24  ;;  %v1044_v30 = vmul.f32 %v2761_v51, %v1001_v7  ;;  %v3506_v40 = vld [vmem:[#allocation22_spill] sm:$0xff] }
 0x258   : > { %v1202_v1 = vadd.f32 %v1194_v52, %v1129_v58  ;;  %v1073_v53 = vsel %vm562_vm7, %v2924_v21, %v1066_v60  ;;  %v1077_v33 = vsel %vm562_vm7, %v1066_v60, %v2924_v21 }
 0x259   : > { %v1049_v37 = vadd.f32 %v1041_v27, %v976_v4  ;;  %v1043_v31 = vmul.f32 %v2761_v51, %v1010_v46  ;;  %v1052_v17 = vadd.f32 %v1044_v30, %v979_v36  ;;  %v1081_v32 = vmul.f32 %v1077_v33, %v2589_v39  ;;  %v1068_v50 = vpop.permute.xlu1 %1067  ;;  %v1216_v41 = vpop.permute.xlu0 %1215 }
 0x25a   : > { %v1082_v26 = vmul.f32 %v2596_v45, %v1073_v53  ;;  %v1074_v44 = vsel %vm562_vm7, %v2926_v23, %v1068_v50  ;;  %v1078_v47 = vsel %vm562_vm7, %v1068_v50, %v2926_v23  ;;  %v1221_v21 = vsel %vm602_vm11, %v2928_v20, %v1216_v41 }
 0x25b   : > { %v1051_v51 = vadd.f32 %v1043_v31, %v978_v6  ;;  %v1114_v4 = vmul.f32 %v2775_v5, %v1081_v32  ;;  %v1083_v10 = vmul.f32 %v1078_v47, %v2589_v39  ;;  %v1084_v62 = vmul.f32 %v2596_v45, %v1074_v44  ;;  %v3511_v47 = vld [vmem:[#allocation8_spill] sm:$0xff] }
 0x25c   : > { %v1115_v48 = vmul.f32 %v2775_v5, %v1082_v26  ;;  %v1225_v18 = vsel %vm602_vm11, %v1216_v41, %v2928_v20  ;;  %v1231_v55 = vmul.f32 %v2580_v34, %v1221_v21  ;;  %v3512_v21 = vld [vmem:[#allocation24_spill] sm:$0xff] }
 0x25d   : > { %v1122_v23 = vadd.f32 %v1114_v4, %v1049_v37  ;;  %v1116_v8 = vmul.f32 %v2782_v56, %v1083_v10  ;;  %v1117_v9 = vmul.f32 %v2782_v56, %v1084_v62  ;;  %v1232_v6 = vmul.f32 %v2596_v45, %v1225_v18  ;;  %v1218_v14 = vpop.permute.xlu1 %1217  ;;  %v1139_v36 = vpop.permute.xlu0 %1138 }
 0x25e   : > { %v1123_v39 = vadd.f32 %v1115_v48, %v1050_v54  ;;  %v1264_v0 = vmul.f32 %v2788_v57, %v1231_v55  ;;  %v1222_v5 = vsel %vm602_vm11, %v2930_v22, %v1218_v14  ;;  %v1226_v20 = vsel %vm602_vm11, %v1218_v14, %v2930_v22  ;;  %v3508_v54 = vld [vmem:[#allocation6_spill] sm:$0xff]  ;;  %v3513_v55 = vld [vmem:[#allocation25_spill] sm:$0xff] }
 0x25f   : > { %v1124_v12 = vadd.f32 %v1116_v8, %v1051_v51  ;;  %v1125_v38 = vadd.f32 %v1117_v9, %v1052_v17  ;;  %v1265_v2 = vmul.f32 %v2788_v57, %v1232_v6  ;;  %v1233_v56 = vmul.f32 %v2580_v34, %v1222_v5  ;;  %v3509_v17 = vld [vmem:[#allocation7_spill] sm:$0xff]  ;;  %v3514_v14 = vld [vmem:[#allocation9_spill] sm:$0xff] }
 0x260   : > { %v1272_v58 = vadd.f32 %v1264_v0, %v1199_v11  ;;  %v1234_v59 = vmul.f32 %v2596_v45, %v1226_v20  ;;  %v1146_v43 = vsel %vm582_vm10, %v2932_v19, %v1139_v36  ;;  %v1150_v42 = vsel %vm582_vm10, %v1139_v36, %v2932_v19  ;;  %v3507_v19 = vld [vmem:[#allocation23_spill] sm:$0xff] }
 0x261   : > { %v1273_v49 = vadd.f32 %v1265_v2, %v1200_v15  ;;  %v1266_v22 = vmul.f32 %v3505_v3, %v1233_v56  ;;  %v1154_v35 = vmul.f32 %v2564_v25, %v1150_v42  ;;  %v1155_v57 = vmul.f32 %v2568_v28, %v1146_v43  ;;  %v1141_v29 = vpop.permute.xlu1 %1140  ;;  %v1289_v61 = vpop.permute.xlu0 %1288  ;;  %v3517_v42 = vld [vmem:[#allocation10_spill] sm:$0xff] }
 0x262   : > { %v1267_v11 = vmul.f32 %v3505_v3, %v1234_v59  ;;  %v1147_v16 = vsel %vm582_vm10, %v3506_v40, %v1141_v29  ;;  %v1151_v60 = vsel %vm582_vm10, %v1141_v29, %v3506_v40  ;;  %v1294_v15 = vsel %vm622_vm12, %v3507_v19, %v1289_v61  ;;  %v3518_v29 = vld [vmem:[#allocation12_spill] sm:$0xff] }
 0x263   : > { %v1274_v52 = vadd.f32 %v1266_v22, %v1201_v63  ;;  %v1187_v7 = vmul.f32 %v3508_v54, %v1154_v35  ;;  %v1188_v24 = vmul.f32 %v3508_v54, %v1155_v57  ;;  %v1156_v27 = vmul.f32 %v2564_v25, %v1151_v60  ;;  %v3510_v63 = vld [vmem:[#allocation3_spill] sm:$0xff] }
 0x264   : > { %v1275_v46 = vadd.f32 %v1267_v11, %v1202_v1  ;;  %v1157_v30 = vmul.f32 %v2568_v28, %v1147_v16  ;;  %v1298_v53 = vsel %vm622_vm12, %v1289_v61, %v3507_v19  ;;  %v1304_v33 = vmul.f32 %v2564_v25, %v1294_v15  ;;  %v3519_v16 = vld [vmem:[#allocation11_spill] sm:$0xff]  ;;  %v3520_v15 = vld [vmem:[#allocation2_spill] sm:$0xff] }
 0x265   : > { %v1195_v37 = vadd.f32 %v1187_v7, %v1122_v23  ;;  %v1196_v31 = vadd.f32 %v1188_v24, %v1123_v39  ;;  %v1189_v32 = vmul.f32 %v3509_v17, %v1156_v27  ;;  %v1305_v50 = vmul.f32 %v1298_v53, %v3510_v63  ;;  %v1291_v41 = vpop.permute.xlu1 %1290  ;;  %v1212_v26 = vpop.permute.xlu0 %1211 }
 0x266   : > { %v1190_v44 = vmul.f32 %v3509_v17, %v1157_v30  ;;  %v1337_v1 = vmul.f32 %v3511_v47, %v1304_v33  ;;  %v1295_v28 = vsel %vm622_vm12, %v3512_v21, %v1291_v41  ;;  %v1299_v51 = vsel %vm622_vm12, %v1291_v41, %v3512_v21  ;;  %v3523_v41 = vld [vmem:[#allocation29_spill] sm:$0xff] }
 0x267   : > { %v1197_v4 = vadd.f32 %v1189_v32, %v1124_v12  ;;  %v1338_v10 = vmul.f32 %v3511_v47, %v1305_v50  ;;  %v1306_v62 = vmul.f32 %v2564_v25, %v1295_v28  ;;  %v1307_v48 = vmul.f32 %v1299_v51, %v3510_v63  ;;  %v3522_v32 = vld [vmem:[#allocation13_spill] sm:$0xff] }
 0x268   : > { %v1198_v18 = vadd.f32 %v1190_v44, %v1125_v38  ;;  %v1219_v23 = vsel %vm602_vm11, %v3513_v55, %v1212_v26  ;;  %v1223_v8 = vsel %vm602_vm11, %v1212_v26, %v3513_v55  ;;  %v1345_v9 = vadd.f32 %v1337_v1, %v1272_v58  ;;  %v3515_v38 = vld [vmem:[#allocation26_spill] sm:$0xff]  ;;  %v3516_v58 = vld [vmem:[#allocation27_spill] sm:$0xff] }
 0x269   : > { %v1346_v6 = vadd.f32 %v1338_v10, %v1273_v49  ;;  %v1339_v36 = vmul.f32 %v3514_v14, %v1306_v62  ;;  %v1340_v39 = vmul.f32 %v3514_v14, %v1307_v48  ;;  %v1227_v0 = vmul.f32 %v2580_v34, %v1219_v23  ;;  %v1214_v5 = vpop.permute.xlu1 %1213  ;;  %v1362_v20 = vpop.permute.xlu0 %1361  ;;  %v3524_v10 = vld [vmem:[#allocation30_spill] sm:$0xff] }
 0x26a   : > { %v1228_v12 = vmul.f32 %v2596_v45, %v1223_v8  ;;  %v1220_v2 = vsel %vm602_vm11, %v3515_v38, %v1214_v5  ;;  %v1224_v56 = vsel %vm602_vm11, %v1214_v5, %v3515_v38  ;;  %v1367_v59 = vsel %vm642_vm13, %v3516_v58, %v1362_v20  ;;  %v3526_v8 = vld [vmem:[#allocation14_spill] sm:$0xff]  ;;  %v3528_v38 = vld [vmem:[#allocation4_spill] sm:$0xff] }
 0x26b   : > { %v1348_v43 = vadd.f32 %v1340_v39, %v1275_v46  ;;  %v1260_v49 = vmul.f32 %v3517_v42, %v1227_v0  ;;  %v1229_v3 = vmul.f32 %v2580_v34, %v1220_v2  ;;  %v1230_v22 = vmul.f32 %v2596_v45, %v1224_v56  ;;  %v3521_v46 = vld [vmem:[#allocation28_spill] sm:$0xff] }
 0x26c   : > { %v1261_v35 = vmul.f32 %v3517_v42, %v1228_v12  ;;  %v1371_v57 = vsel %vm642_vm13, %v1362_v20, %v3516_v58  ;;  %v1410_v61 = vmul.f32 %v3518_v29, %v1367_v59  ;;  %v1347_v11 = vadd.f32 %v1339_v36, %v1274_v52  ;;  %v3527_v20 = vld [vmem:[#allocation15_spill] sm:$0xff]  ;;  %v3529_v42 = vld [vmem:[#allocation16_spill] sm:$0xff] }
 0x26d   : > { %v1268_v40 = vadd.f32 %v1260_v49, %v1195_v37  ;;  %v1262_v60 = vmul.f32 %v3519_v16, %v1229_v3  ;;  %v1263_v19 = vmul.f32 %v3519_v16, %v1230_v22  ;;  %v1378_v54 = vmul.f32 %v3520_v15, %v1371_v57  ;;  %v1364_v7 = vpop.permute.xlu1 %1363  ;;  %v1285_v24 = vpop.permute.xlu0 %1284  ;;  %v3530_v49 = vld [vmem:[#allocation32_spill] sm:$0xff] }
 0x26e   : > { %v1269_v27 = vadd.f32 %v1261_v35, %v1196_v31  ;;  %v1418_v45 = vadd.f32 %v1410_v61, %v1345_v9  ;;  %v1368_v30 = vsel %vm642_vm13, %v3521_v46, %v1364_v7  ;;  %v1372_v53 = vsel %vm642_vm13, %v1364_v7, %v3521_v46  ;;  %v3533_v7 = vld [vmem:[#allocation17_spill] sm:$0xff] }
 0x26f   : > { %v1270_v52 = vadd.f32 %v1262_v60, %v1197_v4  ;;  %v1271_v33 = vadd.f32 %v1263_v19, %v1198_v18  ;;  %v1411_v37 = vmul.f32 %v3518_v29, %v1378_v54  ;;  %v1380_v17 = vmul.f32 %v3520_v15, %v1372_v53  ;;  %v3525_v18 = vld [vmem:[#allocation31_spill] sm:$0xff]  ;;  %v3531_v29 = vld [vmem:[#allocation33_spill] sm:$0xff]  ;;  %v3532_v60 = vld [vmem:[#allocation18_spill] sm:$0xff] }
 0x270   : > { %v1412_v50 = vmul.f32 %v3522_v32, %v1368_v30  ;;  %v1292_v31 = vsel %vm622_vm12, %v3523_v41, %v1285_v24  ;;  %v1296_v26 = vsel %vm622_vm12, %v1285_v24, %v3523_v41 }
 0x271   : > { %v1419_v44 = vadd.f32 %v1411_v37, %v1346_v6  ;;  %v1413_v47 = vmul.f32 %v3522_v32, %v1380_v17  ;;  %v1300_v1 = vmul.f32 %v2564_v25, %v1292_v31  ;;  %v1301_v21 = vmul.f32 %v1296_v26, %v3510_v63  ;;  %v1287_v28 = vpop.permute.xlu1 %1286  ;;  %v1435_v51 = vpop.permute.xlu0 %1434 }
 0x272   : > { %v1420_v4 = vadd.f32 %v1412_v50, %v1347_v11  ;;  %v1293_v62 = vsel %vm622_vm12, %v3524_v10, %v1287_v28  ;;  %v1297_v48 = vsel %vm622_vm12, %v1287_v28, %v3524_v10  ;;  %v1440_v55 = vsel %vm662_vm14, %v3525_v18, %v1435_v51  ;;  %v3536_v28 = vld [vmem:[#allocation35_spill] sm:$0xff] }
 0x273   : > { %v1421_v23 = vadd.f32 %v1413_v47, %v1348_v43  ;;  %v1333_v9 = vmul.f32 %v3526_v8, %v1300_v1  ;;  %v1334_v6 = vmul.f32 %v3526_v8, %v1301_v21  ;;  %v1302_v14 = vmul.f32 %v2564_v25, %v1293_v62  ;;  %v3535_v1 = vld [vmem:[#allocation19_spill] sm:$0xff] }
 0x274   : > { %v1303_v36 = vmul.f32 %v1297_v48, %v3510_v63  ;;  %v1444_v39 = vsel %vm662_vm14, %v1435_v51, %v3525_v18  ;;  %v1450_v0 = vmul.f32 %v2580_v34, %v1440_v55 }
 0x275   : > { %v1342_v5 = vadd.f32 %v1334_v6, %v1269_v27  ;;  %v1335_v12 = vmul.f32 %v3527_v20, %v1302_v14  ;;  %v1451_v2 = vmul.f32 %v1444_v39, %v3528_v38  ;;  %v1437_v56 = vpop.permute.xlu1 %1436  ;;  %v1358_v58 = vpop.permute.xlu0 %1357  ;;  %v1341_v59 = vadd.f32 %v1333_v9, %v1268_v40  ;;  %v3538_v6 = vld [vmem:[#allocation20_spill] sm:$0xff] }
 0x276   : > { %v1336_v43 = vmul.f32 %v3527_v20, %v1303_v36  ;;  %v1483_v25 = vmul.f32 %v3529_v42, %v1450_v0  ;;  %v1441_v63 = vsel %vm662_vm14, %v3530_v49, %v1437_v56  ;;  %v1445_v3 = vsel %vm662_vm14, %v1437_v56, %v3530_v49  ;;  %v3539_v56 = vld [vmem:[#allocation21_spill] sm:$0xff] }
 0x277   : > { %v1484_v22 = vmul.f32 %v3529_v42, %v1451_v2  ;;  %v1452_v35 = vmul.f32 %v2580_v34, %v1441_v63  ;;  %v1453_v57 = vmul.f32 %v1445_v3, %v3528_v38  ;;  %v1365_v61 = vsel %vm642_vm13, %v3531_v29, %v1358_v58 }
 0x278   : > { %v1344_v11 = vadd.f32 %v1336_v43, %v1271_v33  ;;  %v1491_v40 = vadd.f32 %v1483_v25, %v1418_v45  ;;  %v1369_v16 = vsel %vm642_vm13, %v1358_v58, %v3531_v29  ;;  %v1406_v19 = vmul.f32 %v3532_v60, %v1365_v61  ;;  %v3534_v33 = vld [vmem:[#allocation34_spill] sm:$0xff] }
 0x279   : > { %v1492_v54 = vadd.f32 %v1484_v22, %v1419_v44  ;;  %v1485_v24 = vmul.f32 %v3533_v7, %v1452_v35  ;;  %v1486_v27 = vmul.f32 %v3533_v7, %v1453_v57  ;;  %v1374_v46 = vmul.f32 %v3520_v15, %v1369_v16  ;;  %v1360_v30 = vpop.permute.xlu1 %1359  ;;  %v1431_v53 = vpop.permute.xlu0 %1430 }
 0x27a   : > { %v1499_v37 = vmax.f32 %v1491_v40, 0.0  ;;  %v1414_v17 = vadd.f32 %v1406_v19, %v1341_v59  ;;  %v1343_v32 = vadd.f32 %v1335_v12, %v1270_v52  ;;  %v1366_v45 = vsel %vm642_vm13, %v3534_v33, %v1360_v30  ;;  %v2151_v19 = vld [vmem:[%s3424_s9] sm:$0xff]  }
 0x27b   : > { %v1493_v50 = vadd.f32 %v1485_v24, %v1420_v4  ;;  %v1494_v41 = vadd.f32 %v1486_v27, %v1421_v23  ;;  %v1407_v31 = vmul.f32 %v3532_v60, %v1374_v46  ;;  %v1370_v26 = vsel %vm642_vm13, %v1360_v30, %v3534_v33  ;;  %v3537_v23 = vld [vmem:[#allocation36_spill] sm:$0xff]  ;;  %v2153_v24 = vld [vmem:[%s3424_s9 + $0x8] sm:$0xff]   ;;  %v2154_v27 = vld [vmem:[%s3424_s9 + $0x20] sm:$0xff]  }
 0x27c   : > { %v1507_v44 = vmin.f32 %v1499_v37, 6.0  ;;  %v1376_v47 = vmul.f32 %v3520_v15, %v1370_v26  ;;  %v1408_v21 = vmul.f32 %v3535_v1, %v1366_v45  ;;  %v1438_v52 = vsel %vm662_vm14, %v3536_v28, %v1431_v53  ;;  %v2155_v46 = vld [vmem:[%s3424_s9 + $0x10] sm:$0xff]   ;;  %v2156_v30 = vld [vmem:[%s3424_s9 + $0x28] sm:$0xff]   ;;  %v2158_v37 = vld [vmem:[%s3424_s9 + $0x38] sm:$0xff]  }
 0x27d   : > { %v1501_v51 = vmax.f32 %v1493_v50, 0.0  ;;  %v1415_v10 = vadd.f32 %v1407_v31, %v1342_v5  ;;  %v1442_v4 = vsel %vm662_vm14, %v1431_v53, %v3536_v28  ;;  %v1446_v62 = vmul.f32 %v2580_v34, %v1438_v52  ;;  %v1433_v48 = vpop.permute.xlu1 %1432  ;;  %v2157_v53 = vld [vmem:[%s3424_s9 + $0x30] sm:$0xff]  }
 0x27e   : > { %v1409_v18 = vmul.f32 %v3535_v1, %v1376_v47  ;;  %v1416_v55 = vadd.f32 %v1408_v21, %v1343_v32  ;;  %v1447_v15 = vmul.f32 %v1442_v4, %v3528_v38  ;;  %v1439_v8 = vsel %vm662_vm14, %v3537_v23, %v1433_v48 }
 0x27f   : > { %v1509_v9 = vmin.f32 %v1501_v51, 6.0  ;;  %v1479_v14 = vmul.f32 %v3538_v6, %v1446_v62  ;;  %v1443_v36 = vsel %vm662_vm14, %v1433_v48, %v3537_v23  ;;  %v1448_v39 = vmul.f32 %v2580_v34, %v1439_v8 }
 0x280   : > { %v1417_v0 = vadd.f32 %v1409_v18, %v1344_v11  ;;  %v1480_v5 = vmul.f32 %v3538_v6, %v1447_v15  ;;  %v1449_v20 = vmul.f32 %v1443_v36, %v3528_v38  ;;  %v1500_v12 = vmax.f32 %v1492_v54, 0.0  ;;  %v2152_v54 = vld [vmem:[%s3424_s9 + $0x18] sm:$0xff]  }
 0x281   : > { %v1487_v2 = vadd.f32 %v1479_v14, %v1414_v17  ;;  %v1481_v58 = vmul.f32 %v3539_v56, %v1448_v39  ;;  %v1502_v59 = vmax.f32 %v1494_v41, 0.0  ;;  %v1529_v43 = vpack.c.bf16 %v1509_v9, %v1507_v44 }
 0x282   : > { %v1488_v42 = vadd.f32 %v1480_v5, %v1415_v10  ;;  %v1482_v25 = vmul.f32 %v3539_v56, %v1449_v20  ;;  %v1508_v13 = vmin.f32 %v1500_v12, 6.0  ;;  %v3540_v7 = vmov 0  }
 0x283   : > { %v1495_v49 = vmax.f32 %v1487_v2, 0.0  ;;  %v1489_v63 = vadd.f32 %v1481_v58, %v1416_v55  ;;  %v1510_v3 = vmin.f32 %v1502_v59, 6.0 }
 0x284   : > { %v1490_v22 = vadd.f32 %v1482_v25, %v1417_v0  ;;  %v1496_v34 = vmax.f32 %v1488_v42, 0.0 }
 0x285   : > { %v1497_v35 = vmax.f32 %v1489_v63, 0.0  ;;  %v1530_v57 = vpack.c.bf16 %v1510_v3, %v1508_v13  ;;  %v1503_v61 = vmin.f32 %v1495_v49, 6.0 }
 0x286   : > { %v1498_v29 = vmax.f32 %v1490_v22, 0.0  ;;  %v1504_v11 = vmin.f32 %v1496_v34, 6.0 }
 0x287   : > { %v1505_v38 = vmin.f32 %v1497_v35, 6.0  ;;  %1607 = vmatprep.subr.bf16.mxu0 %v1530_v57  ;;  %2123 = vmatprep.subr.bf16.mxu1 %v1530_v57 }
 0x288   : > { %1608 = vmatpush1.bf16.msra.mxu0 %v1529_v43  ;;  %2125 = vmatpush1.bf16.msra.mxu1 %v1529_v43  ;;  %v1506_v40 = vmin.f32 %v1498_v29, 6.0 }
 0x289   : > { %v1527_v16 = vpack.c.bf16 %v1505_v38, %v1503_v61 }
 0x28a   : > { %v1528_v60 = vpack.c.bf16 %v1506_v40, %v1504_v11 }
 0x28c   : > { %1609 = vmatprep.subr.bf16.mxu0 %v1528_v60  ;;  %2124 = vmatprep.subr.bf16.mxu1 %v1528_v60 }
 0x28d   : > { %1610 = vmatpush1.bf16.msra.mxu0 %v1527_v16  ;;  %2126 = vmatpush1.bf16.msra.mxu1 %v1527_v16 }
 0x290   : > { %2106 = vmatmul.mubr.msk.bf16.vlgmr.msra.gmra.mxu0 %vm710_vm0, %v2151_v19  ;;  %2109 = vmatmul.mubr.msk.bf16.vlgmr.msra.gmra.mxu1 %vm710_vm0, %v2152_v54 }
 0x291   : > { %1637 = vmatprep.mubr.bf16.mxu0 %v3540_v7  ;;  %1667 = vmatprep.mubr.bf16.mxu1 %v3540_v7 }
 0x298   : > { %2107 = vmatmul.mubr.msk.bf16.gmra.mxu0 %vm710_vm0, %v2153_v24  ;;  %2110 = vmatmul.mubr.msk.bf16.gmra.mxu1 %vm710_vm0, %v2154_v27 }
 0x299   : > { %1647 = vmatprep.mubr.bf16.mxu0 %v3540_v7  ;;  %1677 = vmatprep.mubr.bf16.mxu1 %v3540_v7 }
 0x2a0   : > { %2108 = vmatmul.mubr.msk.bf16.gmra.mxu0 %vm710_vm0, %v2155_v46  ;;  %2111 = vmatmul.mubr.msk.bf16.gmra.mxu1 %vm710_vm0, %v2156_v30 }
 0x2a1   : > { %1687 = vmatprep.mubr.bf16.mxu1 %v3540_v7 }
 0x2a8   : > { %2112 = vmatmul.mubr.msk.bf16.gmra.mxu1 %vm710_vm0, %v2157_v53 }
 0x2a9   : > { %1697 = vmatprep.mubr.bf16.mxu1 %v3540_v7 }
 0x2b0   : > { %2113 = vmatmul.mubr.msk.bf16.gmra.mxu1 %vm710_vm0, %v2158_v37 }
 0x350   : > { %v1629_v17 = vpop.f32.mrf.mxu0  ;;  %v1659_v32 = vpop.f32.mrf.mxu1 }
 0x351   : > { %v1720_v33 = vsub.f32 0.0, %v1659_v32  ;;  %v1708_v36 = vsub.f32 0.0, %v1629_v17 }
 0x352   : > { %v1631_v45 = vpop.f32.mrf.mxu0  ;;  %v1661_v50 = vpop.f32.mrf.mxu1 }
 0x353   : > { %v1756_v41 = vmul.f32 1.442695, %v1720_v33  ;;  %v1721_v31 = vsub.f32 0.0, %v1661_v50  ;;  %v1709_v5 = vsub.f32 0.0, %v1631_v45  ;;  %v1732_v59 = vmul.f32 1.442695, %v1708_v36 }
 0x354   : > { %v1633_v26 = vpop.f32.mrf.mxu0  ;;  %v1663_v44 = vpop.f32.mrf.mxu1 }
 0x355   : > { %v1758_v47 = vmul.f32 1.442695, %v1721_v31  ;;  %2159 = vpow2.f32 %v1756_v41  ;;  %v1722_v1 = vsub.f32 0.0, %v1663_v44  ;;  %v1710_v2 = vsub.f32 0.0, %v1633_v26 }
 0x356   : > { %v1635_v21 = vpop.f32.mrf.mxu0  ;;  %v1665_v28 = vpop.f32.mrf.mxu1  ;;  %v1734_v49 = vmul.f32 1.442695, %v1709_v5 }
 0x357   : > { %v1723_v52 = vsub.f32 0.0, %v1665_v28  ;;  %2161 = vpow2.f32 %v1758_v47  ;;  %v1760_v51 = vmul.f32 1.442695, %v1722_v1  ;;  %v1711_v43 = vsub.f32 0.0, %v1635_v21 }
 0x358   : > { %v1639_v10 = vpop.f32.mrf.mxu0  ;;  %v1669_v4 = vpop.f32.mrf.mxu1  ;;  %v1736_v13 = vmul.f32 1.442695, %v1710_v2 }
 0x359   : > { %v1762_v62 = vmul.f32 1.442695, %v1723_v52  ;;  %v1712_v48 = vsub.f32 0.0, %v1639_v10  ;;  %2163 = vpow2.f32 %v1760_v51  ;;  %v1724_v63 = vsub.f32 0.0, %v1669_v4 }
 0x35a   : > { %v1641_v18 = vpop.f32.mrf.mxu0  ;;  %v1671_v55 = vpop.f32.mrf.mxu1  ;;  %v1738_v57 = vmul.f32 1.442695, %v1711_v43 }
 0x35b   : > { %v1740_v15 = vmul.f32 1.442695, %v1712_v48  ;;  %v1713_v23 = vsub.f32 0.0, %v1641_v18  ;;  %2165 = vpow2.f32 %v1762_v62  ;;  %v1764_v38 = vmul.f32 1.442695, %v1724_v63 }
 0x35c   : > { %v1643_v8 = vpop.f32.mrf.mxu0  ;;  %v3324_v9 = vpop.f32.mrf.mxu1  ;;  %v1725_v7 = vsub.f32 0.0, %v1671_v55 }
 0x35d   : > { %2167 = vpow2.f32 %v1740_v15  ;;  %v1742_v6 = vmul.f32 1.442695, %v1713_v23  ;;  %v1714_v14 = vsub.f32 0.0, %v1643_v8  ;;  %v1726_v53 = vsub.f32 0.0, %v3324_v9 }
 0x35e   : > { %v1645_v39 = vpop.f32.mrf.mxu0  ;;  %v3326_v0 = vpop.f32.mrf.mxu1  ;;  %v1766_v50 = vmul.f32 1.442695, %v1725_v7 }
 0x35f   : > { %2169 = vpow2.f32 %v1742_v6  ;;  %v1744_v20 = vmul.f32 1.442695, %v1714_v14  ;;  %v1715_v12 = vsub.f32 0.0, %v1645_v39  ;;  %v1768_v1 = vmul.f32 1.442695, %v1726_v53 }
 0x360   : > { %v1679_v56 = vpop.f32.mrf.mxu1  ;;  %v1649_v3 = vpop.f32.mrf.mxu0  ;;  %v1727_v2 = vsub.f32 0.0, %v3326_v0 }
 0x361   : > { %2171 = vpow2.f32 %v1744_v20  ;;  %v1746_v58 = vmul.f32 1.442695, %v1715_v12  ;;  %v1716_v33 = vsub.f32 0.0, %v1649_v3  ;;  %v1728_v41 = vsub.f32 0.0, %v1679_v56 }
 0x362   : > { %v3328_v42 = vpop.f32.mrf.mxu1  ;;  %v2160_v25 = vpop.eup %2159 }
 0x363   : > { %2173 = vpow2.f32 %v1746_v58  ;;  %v1792_v35 = vadd.f32 1.0, %v2160_v25  ;;  %v1651_v40 = vpop.f32.mrf.mxu0  ;;  %v1729_v21 = vsub.f32 0.0, %v3328_v42  ;;  %v1748_v10 = vmul.f32 1.442695, %v1716_v33  ;;  %v1848_v58 = vld [vmem:[%s3349_s13 + $0x20] sm:$0xff] }
 0x364   : > { %v3330_v22 = vpop.f32.mrf.mxu1  ;;  %v2162_v34 = vpop.eup %2161  ;;  %2175 = vpow2.f32 %v1732_v59  ;;  %v1717_v44 = vsub.f32 0.0, %v1651_v40  ;;  %v1772_v62 = vmul.f32 1.442695, %v1728_v41 }
 0x365   : > { %2177 = vpow2.f32 %v1734_v49  ;;  %v1793_v11 = vadd.f32 1.0, %v2162_v34  ;;  %v1653_v37 = vpop.f32.mrf.mxu0  ;;  %v1730_v48 = vsub.f32 0.0, %v3330_v22  ;;  %v1774_v6 = vmul.f32 1.442695, %v1729_v21 }
 0x366   : > { %v3332_v29 = vpop.f32.mrf.mxu1  ;;  %v2164_v61 = vpop.eup %2163  ;;  %2179 = vpow2.f32 %v1736_v13  ;;  %v1718_v4 = vsub.f32 0.0, %v1653_v37  ;;  %v1750_v15 = vmul.f32 1.442695, %v1717_v44 }
 0x367   : > { %2181 = vrcp.f32 %v1792_v35  ;;  %v1794_v54 = vadd.f32 1.0, %v2164_v61  ;;  %v1655_v28 = vpop.f32.mrf.mxu0  ;;  %v1731_v14 = vsub.f32 0.0, %v3332_v29  ;;  %v1776_v56 = vmul.f32 1.442695, %v1730_v48  ;;  %v1849_v29 = vld [vmem:[%s3349_s13 + $0x28] sm:$0xff] }
 0x368   : > { %v3334_v16 = vpop.f32.mrf.mxu1  ;;  %v2166_v60 = vpop.eup %2165  ;;  %2183 = vpow2.f32 %v1738_v57  ;;  %v1719_v23 = vsub.f32 0.0, %v1655_v28  ;;  %v1752_v5 = vmul.f32 1.442695, %v1718_v4  ;;  %v1770_v57 = vmul.f32 1.442695, %v1727_v2 }
 0x369   : > { %2185 = vpow2.f32 %v1764_v38  ;;  %v1795_v30 = vadd.f32 1.0, %v2166_v60  ;;  %v1778_v13 = vmul.f32 1.442695, %v1731_v14 }
 0x36a   : > { %v2168_v19 = vpop.eup %2167  ;;  %v3336_v24 = vpop.f32.mrf.mxu1  ;;  %2187 = vrcp.f32 %v1793_v11  ;;  %v1754_v42 = vmul.f32 1.442695, %v1719_v23 }
 0x36b   : > { %v1784_v27 = vadd.f32 1.0, %v2168_v19  ;;  %v1850_v19 = vld [vmem:[%s3349_s13 + $0x30] sm:$0xff] }
 0x36c   : > { %v2170_v46 = vpop.eup %2169  ;;  %v3339_v17 = vpop.f32.mrf.mxu1 }
 0x36d   : > { %2189 = vrcp.f32 %v1784_v27  ;;  %v1785_v32 = vadd.f32 1.0, %v2170_v46 }
 0x36e   : > { %v2172_v45 = vpop.eup %2171  ;;  %2191 = vrcp.f32 %v1794_v54  ;;  %v3341_v31 = vpop.f32.mrf.mxu1 }
 0x36f   : > { %2193 = vrcp.f32 %v1785_v32  ;;  %v1786_v26 = vadd.f32 1.0, %v2172_v45  ;;  %v1851_v32 = vld [vmem:[%s3349_s13 + $0x38] sm:$0xff] }
 0x370   : > { %v2174_v47 = vpop.eup %2173  ;;  %2195 = vrcp.f32 %v1795_v30  ;;  %v1699_v52 = vpop.f32.mrf.mxu1 }
 0x371   : > { %2197 = vrcp.f32 %v1786_v26  ;;  %v1787_v51 = vadd.f32 1.0, %v2174_v47  ;;  %v2176_v55 = vpop.eup %2175  ;;  %v1832_v8 = vmax.f32 %v1699_v52, 0.0 }
 0x372   : > { %2199 = vpow2.f32 %v1766_v50  ;;  %v1701_v18 = vpop.f32.mrf.mxu1  ;;  %v2178_v9 = vpop.eup %2177  ;;  %v1780_v60 = vadd.f32 1.0, %v2176_v55 }
 0x373   : > { %2201 = vrcp.f32 %v1787_v51  ;;  %v2180_v39 = vpop.eup %2179  ;;  %v1833_v20 = vmax.f32 %v1701_v18, 0.0  ;;  %v1840_v25 = vmin.f32 %v1832_v8, 6.0  ;;  %v1781_v37 = vadd.f32 1.0, %v2178_v9 }
 0x374   : > { %2203 = vpow2.f32 %v1768_v1  ;;  %v1703_v36 = vpop.f32.mrf.mxu1  ;;  %v2182_v12 = vpop.eup %2181  ;;  %v1782_v45 = vadd.f32 1.0, %v2180_v39 }
 0x375   : > { %2205 = vpow2.f32 %v1748_v10  ;;  %v2184_v43 = vpop.eup %2183  ;;  %v1834_v49 = vmax.f32 %v1703_v36, 0.0  ;;  %v1856_v22 = vmul.f32 %v2182_v12, %v1848_v58  ;;  %v1841_v0 = vmin.f32 %v1833_v20, 6.0 }
 0x376   : > { %2207 = vpow2.f32 %v1772_v62  ;;  %v1705_v59 = vpop.f32.mrf.mxu1  ;;  %v3354_v63 = vpop.eup %2185  ;;  %v1783_v47 = vadd.f32 1.0, %v2184_v43  ;;  %v1828_v58 = vmax.f32 %v3334_v16, 0.0  ;;  %v1844_v16 = vld [vmem:[%s3349_s13] sm:$0xff] }
 0x377   : > { %2209 = vpow2.f32 %v1750_v15  ;;  %v2188_v3 = vpop.eup %2187  ;;  %v1835_v34 = vmax.f32 %v1705_v59, 0.0  ;;  %v1842_v11 = vmin.f32 %v1834_v49, 6.0 }
 0x378   : > { %2211 = vpow2.f32 %v1774_v6  ;;  %v1857_v27 = vmul.f32 %v2188_v3, %v1849_v29  ;;  %v1836_v3 = vmin.f32 %v1828_v58, 6.0 }
 0x379   : > { %2213 = vpow2.f32 %v1752_v5  ;;  %v1843_v30 = vmin.f32 %v1835_v34, 6.0  ;;  %v1796_v5 = vadd.f32 1.0, %v3354_v63  ;;  %v1831_v34 = vmax.f32 %v3341_v31, 0.0 }
 0x37a   : > { %v2190_v35 = vpop.eup %2189  ;;  %2215 = vpow2.f32 %v1776_v56 }
 0x37b   : > { %v2192_v61 = vpop.eup %2191  ;;  %2217 = vpow2.f32 %v1754_v42  ;;  %v1864_v38 = vmul.f32 %v2190_v35, %v1840_v25  ;;  %v1829_v42 = vmax.f32 %v3336_v24, 0.0 }
 0x37c   : > { %v2194_v40 = vpop.eup %2193  ;;  %2219 = vpow2.f32 %v1778_v13  ;;  %v1858_v41 = vmul.f32 %v2192_v61, %v1850_v19 }
 0x37d   : > { %v2196_v54 = vpop.eup %2195  ;;  %v3364_v7 = vadd.f32 %v1864_v38, %v1856_v22  ;;  %v1865_v46 = vmul.f32 %v2194_v40, %v1841_v0  ;;  %2221 = vpow2.f32 %v1770_v57  ;;  %v1830_v22 = vmax.f32 %v3339_v17, 0.0  ;;  %v1845_v38 = vld [vmem:[%s3349_s13 + $0x8] sm:$0xff] }
 0x37e   : > { %v2198_v53 = vpop.eup %2197  ;;  %2223 = vrcp.f32 %v1780_v60  ;;  %v1859_v28 = vmul.f32 %v2196_v54, %v1851_v32  ;;  %v1837_v29 = vmin.f32 %v1829_v42, 6.0 }
 0x37f   : > { %v2200_v33 = vpop.eup %2199  ;;  %1904 = vst [vmem:[%s3361_s24 + $0x20] sm:$0xff] %v3364_v7  ;;  %v3369_v50 = vadd.f32 %v1865_v46, %v1857_v27  ;;  %v1866_v26 = vmul.f32 %v2198_v53, %v1842_v11  ;;  %2225 = vrcp.f32 %v1781_v37  ;;  %v1880_v59 = vmax.f32 %v3364_v7, 0.0  ;;  %v1846_v7 = vld [vmem:[%s3349_s13 + $0x10] sm:$0xff] }
 0x380   : > { %v2202_v44 = vpop.eup %2201  ;;  %2227 = vrcp.f32 %v1782_v45  ;;  %v1797_v56 = vadd.f32 1.0, %v2200_v33  ;;  %v1838_v19 = vmin.f32 %v1830_v22, 6.0  ;;  %v1839_v27 = vmin.f32 %v1831_v34, 6.0 }
 0x381   : > { %v2204_v1 = vpop.eup %2203  ;;  %1905 = vst [vmem:[%s3361_s24 + $0x28] sm:$0xff] %v3369_v50  ;;  %v3373_v21 = vadd.f32 %v1866_v26, %v1858_v41  ;;  %v1867_v52 = vmul.f32 %v2202_v44, %v1843_v30  ;;  %2229 = vrcp.f32 %v1783_v47  ;;  %v1881_v49 = vmax.f32 %v3369_v50, 0.0  ;;  %v1847_v50 = vld [vmem:[%s3349_s13 + $0x18] sm:$0xff] }
 0x382   : > { %v2206_v51 = vpop.eup %2205  ;;  %v1798_v43 = vadd.f32 1.0, %v2204_v1  ;;  %v1888_v35 = vmin.f32 %v1880_v59, 6.0 }
 0x383   : > { %v2208_v10 = vpop.eup %2207  ;;  %v1788_v4 = vadd.f32 1.0, %v2206_v51  ;;  %1906 = vst [vmem:[%s3361_s24 + $0x30] sm:$0xff] %v3373_v21  ;;  %v3377_v62 = vadd.f32 %v1867_v52, %v1859_v28  ;;  %v1882_v57 = vmax.f32 %v3373_v21, 0.0  ;;  %v1889_v11 = vmin.f32 %v1881_v49, 6.0 }
 0x384   : > { %v2210_v48 = vpop.eup %2209  ;;  %v1800_v18 = vadd.f32 1.0, %v2208_v10 }
 0x385   : > { %v2212_v55 = vpop.eup %2211  ;;  %2231 = vrcp.f32 %v1788_v4  ;;  %v1789_v15 = vadd.f32 1.0, %v2210_v48  ;;  %1907 = vst [vmem:[%s3361_s24 + $0x38] sm:$0xff] %v3377_v62  ;;  %v1883_v40 = vmax.f32 %v3377_v62, 0.0  ;;  %v1890_v30 = vmin.f32 %v1882_v57, 6.0 }
 0x386   : > { %v2214_v23 = vpop.eup %2213  ;;  %2233 = vrcp.f32 %v1800_v18  ;;  %v1801_v8 = vadd.f32 1.0, %v2212_v55 }
 0x387   : > { %v2216_v9 = vpop.eup %2215  ;;  %2235 = vrcp.f32 %v1789_v15  ;;  %v1790_v6 = vadd.f32 1.0, %v2214_v23  ;;  %v1891_v26 = vmin.f32 %v1883_v40, 6.0 }
 0x388   : > { %v2218_v14 = vpop.eup %2217  ;;  %2237 = vrcp.f32 %v1801_v8  ;;  %v1802_v36 = vadd.f32 1.0, %v2216_v9 }
 0x389   : > { %v2220_v39 = vpop.eup %2219  ;;  %2239 = vrcp.f32 %v1790_v6  ;;  %v1791_v20 = vadd.f32 1.0, %v2218_v14 }
 0x38a   : > { %2241 = vrcp.f32 %v1802_v36  ;;  %v1803_v12 = vadd.f32 1.0, %v2220_v39  ;;  %v2222_v2 = vpop.eup %2221 }
 0x38b   : > { %2243 = vrcp.f32 %v1791_v20  ;;  %v2224_v25 = vpop.eup %2223  ;;  %v1799_v13 = vadd.f32 1.0, %v2222_v2 }
 0x38c   : > { %2245 = vrcp.f32 %v1803_v12  ;;  %v2226_v63 = vpop.eup %2225  ;;  %v1860_v31 = vmul.f32 %v2224_v25, %v1836_v3 }
 0x38d   : > { %2247 = vrcp.f32 %v1796_v5  ;;  %v2228_v0 = vpop.eup %2227  ;;  %v1861_v33 = vmul.f32 %v2226_v63, %v1837_v29 }
 0x38e   : > { %2249 = vrcp.f32 %v1797_v56  ;;  %v2230_v24 = vpop.eup %2229  ;;  %v1862_v28 = vmul.f32 %v2228_v0, %v1838_v19 }
 0x38f   : > { %2251 = vrcp.f32 %v1798_v43  ;;  %v1863_v51 = vmul.f32 %v2230_v24, %v1839_v27 }
 0x390   : > { %2253 = vrcp.f32 %v1799_v13 }
 0x392   : > { %v2232_v61 = vpop.eup %2231 }
 0x393   : > { %v2234_v60 = vpop.eup %2233  ;;  %v1852_v17 = vmul.f32 %v2232_v61, %v1844_v16 }
 0x394   : > { %v2236_v54 = vpop.eup %2235  ;;  %v1896_v46 = vmul.f32 %v2234_v60, %v1888_v35 }
 0x395   : > { %v2238_v53 = vpop.eup %2237  ;;  %v1868_v37 = vadd.f32 %v1860_v31, %v1852_v17  ;;  %v1853_v32 = vmul.f32 %v2236_v54, %v1845_v38 }
 0x396   : > { %v2240_v45 = vpop.eup %2239  ;;  %1912 = vst [vmem:[%s3396_s23 + $0x20] sm:$0xff] %v1896_v46  ;;  %v1897_v41 = vmul.f32 %v2238_v53, %v1889_v11 }
 0x397   : > { %v2242_v44 = vpop.eup %2241  ;;  %v1876_v47 = vmax.f32 %v1868_v37, 0.0  ;;  %1900 = vst [vmem:[%s3361_s24] sm:$0xff] %v1868_v37  ;;  %v1869_v1 = vadd.f32 %v1861_v33, %v1853_v32  ;;  %v1854_v21 = vmul.f32 %v2240_v45, %v1846_v7 }
 0x398   : > { %v2244_v52 = vpop.eup %2243  ;;  %1913 = vst [vmem:[%s3396_s23 + $0x28] sm:$0xff] %v1897_v41  ;;  %v1898_v10 = vmul.f32 %v2242_v44, %v1890_v30 }
 0x399   : > { %v2246_v4 = vpop.eup %2245  ;;  %v1884_v62 = vmin.f32 %v1876_v47, 6.0  ;;  %v1877_v48 = vmax.f32 %v1869_v1, 0.0  ;;  %1901 = vst [vmem:[%s3361_s24 + $0x8] sm:$0xff] %v1869_v1  ;;  %v1870_v18 = vadd.f32 %v1862_v28, %v1854_v21  ;;  %v1855_v55 = vmul.f32 %v2244_v52, %v1847_v50 }
 0x39a   : > { %v2248_v15 = vpop.eup %2247  ;;  %1914 = vst [vmem:[%s3396_s23 + $0x30] sm:$0xff] %v1898_v10  ;;  %v1899_v23 = vmul.f32 %v2246_v4, %v1891_v26 }
 0x39b   : > { %v1892_v8 = vmul.f32 %v2248_v15, %v1884_v62  ;;  %v1885_v9 = vmin.f32 %v1877_v48, 6.0  ;;  %v1878_v6 = vmax.f32 %v1870_v18, 0.0  ;;  %1902 = vst [vmem:[%s3361_s24 + $0x10] sm:$0xff] %v1870_v18  ;;  %v1871_v14 = vadd.f32 %v1863_v51, %v1855_v55  ;;  %v2250_v36 = vpop.eup %2249 }
 0x39c   : > { %1915 = vst [vmem:[%s3396_s23 + $0x38] sm:$0xff] %v1899_v23  ;;  %v2252_v12 = vpop.eup %2251 }
 0x39d   : > { %1908 = vst [vmem:[%s3396_s23] sm:$0xff] %v1892_v8  ;;  %v1893_v39 = vmul.f32 %v2250_v36, %v1885_v9  ;;  %v1886_v5 = vmin.f32 %v1878_v6, 6.0  ;;  %v1879_v20 = vmax.f32 %v1871_v14, 0.0  ;;  %1903 = vst [vmem:[%s3361_s24 + $0x18] sm:$0xff] %v1871_v14  ;;  %v2254_v58 = vpop.eup %2253 }
 0x39f   : > { %1909 = vst [vmem:[%s3396_s23 + $0x8] sm:$0xff] %v1893_v39  ;;  %v1894_v2 = vmul.f32 %v2252_v12, %v1886_v5  ;;  %v1887_v56 = vmin.f32 %v1879_v20, 6.0 }
 0x3a1   : > { %1910 = vst [vmem:[%s3396_s23 + $0x10] sm:$0xff] %v1894_v2  ;;  %v1895_v59 = vmul.f32 %v2254_v58, %v1887_v56 }
 0x3a3   : > { %1911 = vst [vmem:[%s3396_s23 + $0x18] sm:$0xff] %v1895_v59 }
 0x3a4 PF: > { %s22_s17 = sadd.s32 1, %s2261_s17  }
 0x3a5   : > { %p19_p4 = scmp.ge.s32.totalorder %s22_s17, 4  }
 0x3a7   :  { %21 = sbr.rel (!%p19_p4) target bundleno = 1 (0x1), region = 124 }

</bundles_post_ra>
